<compile_context>
chip_gen: v6e
topology: v6e:2x2x1
jax: 0.10.0
libtpu: 0.0.40
codegen_flags: <defaults>
</compile_context>

<pallas_src>
import functools

import jax
import jax.numpy as jnp
from jax.experimental import pallas as pl
from jax.experimental.pallas import tpu as pltpu


def _round_up(x, m):
    return ((x + m - 1) // m) * m


def _pick_row_block(ho, max_rows=8):
    """Largest divisor of HO that is <= max_rows, so output rows tile evenly."""
    return max(d for d in range(1, min(max_rows, ho) + 1) if ho % d == 0)


@functools.partial(jax.jit, static_argnames=("eps",))
def convolution2d_forward(x_nchw, weight_oihw, bias,
                          bn_gamma, bn_beta, bn_mean, bn_var, eps=1e-5):
    """conv2d (stride 1, VALID) + ReLU + eval-mode BatchNorm2d; NCHW in/out."""
    N, CIN, H, W = x_nchw.shape
    COUT, CIN_w, KH, KW = weight_oihw.shape
    assert CIN == CIN_w
    HO, WO = H - KH + 1, W - KW + 1
    COUT_P = _round_up(COUT, 128)          # lane-dense output channels
    ROW_BLOCK = _pick_row_block(HO)        # output rows per grid step

    # ---- layout plumbing only (bf16 before transpose: 2 B/elt intermediates) ---
    x_nhwc = jnp.transpose(x_nchw.astype(jnp.bfloat16), (0, 2, 3, 1))       # (N,H,W,CIN)
    w_hwio = jnp.transpose(weight_oihw.astype(jnp.bfloat16), (2, 3, 1, 0))  # (KH,KW,CIN,COUT)
    w_hwio = jnp.pad(w_hwio, ((0, 0), (0, 0), (0, 0), (0, COUT_P - COUT)))

    # Fold eval-mode BatchNorm into a per-channel affine; epilogue stays f32.
    scale = (bn_gamma / jnp.sqrt(bn_var + eps)).astype(jnp.float32)
    shift = (bn_beta - bn_mean * scale).astype(jnp.float32)
    pad_c = (0, COUT_P - COUT)
    b2 = jnp.pad(bias.astype(jnp.float32), pad_c).reshape(1, COUT_P)
    scale2 = jnp.pad(scale, pad_c).reshape(1, COUT_P)
    shift2 = jnp.pad(shift, pad_c).reshape(1, COUT_P)

    def kernel(x_ref, w_ref, b_ref, s_ref, t_ref, o_ref):
        # x_ref: (H, W, CIN)         bf16  -- full image, resident across row tiles
        # w_ref: (KH, KW, CIN, COUT_P) bf16 -- resident (DMA'd once)
        # b/s/t: (1, COUT_P)          f32  -- conv bias / BN scale / BN shift
        # o_ref: (ROW_BLOCK, WO, COUT_P) f32
        base = pl.program_id(1) * ROW_BLOCK

        # Trace-time hoists: weight taps, epilogue params, and the
        # ROW_BLOCK + KH - 1 input rows this tile touches are loaded once.
        w_taps = [[w_ref[kh, kw] for kw in range(KW)] for kh in range(KH)]
        b = b_ref[...]
        sc = s_ref[...]
        sh = t_ref[...]
        rows = [x_ref[base + i] for i in range(ROW_BLOCK + KH - 1)]  # each (W, CIN)

        for lr in range(ROW_BLOCK):
            acc = jnp.zeros((WO, COUT_P), jnp.float32)
            for kh in range(KH):
                row = rows[lr + kh]
                for kw in range(KW):
                    # In-kernel im2col: shifted window of the resident row;
                    # bf16 MXU inputs, f32 accumulation.
                    acc += jnp.dot(row[kw:kw + WO, :], w_taps[kh][kw],
                                   preferred_element_type=jnp.float32)
            y = acc + b                      # conv bias
            y = jnp.maximum(y, 0.0)          # ReLU activation
            y = y * sc + sh                  # post-activation BatchNorm (eval)
            # TODO(synk): Dropout2d omitted (dropout=None config; identity in eval).
            o_ref[lr] = y

        # NOTE: for large CIN/COUT, fold the kw taps into the RHS
        # (CIN, KW*COUT_P) for longer MXU runs and use 256-aligned COUT tiles
        # on v6e/v7x; unnecessary at this K / COUT.

    grid = (N, HO // ROW_BLOCK)

    out_padded = pl.pallas_call(
        kernel,
        out_shape=jax.ShapeDtypeStruct((N, HO, WO, COUT_P), jnp.float32),
        grid_spec=pltpu.PrefetchScalarGridSpec(
            num_scalar_prefetch=0,
            grid=grid,
            in_specs=[
                # Full image per batch element; constant over the row-tile axis,
                # so it is DMA'd once per image and stays VMEM-resident.
                pl.BlockSpec((None, H, W, CIN), lambda n, r: (n, 0, 0, 0)),
                # Whole weight resident in VMEM (never re-streamed).
                pl.BlockSpec((KH, KW, CIN, COUT_P), lambda n, r: (0, 0, 0, 0)),
                pl.BlockSpec((1, COUT_P), lambda n, r: (0, 0)),   # bias
                pl.BlockSpec((1, COUT_P), lambda n, r: (0, 0)),   # bn scale
                pl.BlockSpec((1, COUT_P), lambda n, r: (0, 0)),   # bn shift
            ],
            out_specs=pl.BlockSpec((None, ROW_BLOCK, WO, COUT_P),
                                   lambda n, r: (n, r, 0, 0)),
        ),
        compiler_params=pltpu.CompilerParams(
            dimension_semantics=("parallel", "parallel"),
            # Per-step VMEM footprint here is < 1 MiB (image + weight + out slab,
            # double-buffered).  48 MiB leaves ~25% headroom even on v7x's 64 MiB
            # physical VMEM and is far under v5e/v6e's 128 MiB.
            vmem_limit_bytes=48 * 1024 * 1024,
        ),
    )(x_nhwc, w_hwio, b2, scale2, shift2)

    # Strip channel padding; back to PyTorch's NCHW f32 output convention
    # (emit bf16 / NHWC here instead if the downstream consumer allows it).
    out = out_padded[:, :, :, :COUT]
    return jnp.transpose(out, (0, 3, 1, 2))


def _reference(x_nchw, weight_oihw, bias, bn_gamma, bn_beta, bn_mean, bn_var,
               eps=1e-5):
    """Pure-JAX reference. Inputs are bf16-quantized to mirror the kernel's
    bf16 MXU inputs (accumulation in both paths is f32)."""
    xq = x_nchw.astype(jnp.bfloat16).astype(jnp.float32)
    wq = weight_oihw.astype(jnp.bfloat16).astype(jnp.float32)
    y = jax.lax.conv_general_dilated(
        xq, wq, window_strides=(1, 1), padding="VALID",
        dimension_numbers=("NCHW", "OIHW", "NCHW"),
        precision=jax.lax.Precision.HIGHEST)
    y = y + bias.reshape(1, -1, 1, 1)
    y = jnp.maximum(y, 0.0)
    scale = bn_gamma / jnp.sqrt(bn_var + eps)
    shift = bn_beta - bn_mean * scale
    return y * scale.reshape(1, -1, 1, 1) + shift.reshape(1, -1, 1, 1)


if __name__ == "__main__":
    # Small shapes: batch=2, in_channels=4, out_channels=8, 16x16 spatial, 3x3 kernel.
    N, CIN, H, W = 2, 4, 16, 16
    COUT, KH, KW = 8, 3, 3

    key = jax.random.PRNGKey(0)
    kx, kw, kb, kg, kbeta, km, kv = jax.random.split(key, 7)

    x = jax.random.normal(kx, (N, CIN, H, W), dtype=jnp.float32)
    # Deterministic parameter init (synthetic, not a checkpoint).
    weight = jax.random.normal(kw, (COUT, CIN, KH, KW), dtype=jnp.float32) * 0.1
    bias = jax.random.normal(kb, (COUT,), dtype=jnp.float32) * 0.1
    bn_gamma = 1.0 + 0.1 * jax.random.normal(kg, (COUT,), dtype=jnp.float32)
    bn_beta = 0.1 * jax.random.normal(kbeta, (COUT,), dtype=jnp.float32)
    bn_mean = 0.05 * jax.random.normal(km, (COUT,), dtype=jnp.float32)
    bn_var = jnp.abs(1.0 + 0.1 * jax.random.normal(kv, (COUT,), dtype=jnp.float32))

    out = convolution2d_forward(x, weight, bias, bn_gamma, bn_beta, bn_mean, bn_var)
    out = jax.block_until_ready(out)

    ref = _reference(x, weight, bias, bn_gamma, bn_beta, bn_mean, bn_var)
    assert out.shape == (N, COUT, H - KH + 1, W - KW + 1)
    assert jnp.allclose(out, ref, atol=1e-2, rtol=1e-2), "mismatch vs reference"

    print("KERNEL_OK")
</pallas_src>

<mosaic_0001>
module attributes {stable_mosaic.version = 11 : i64} {
  func.func @kernel(%arg0: i32, %arg1: i32, %arg2: memref<1x16x16x4xbf16, #tpu.memory_space<vmem>>, %arg3: memref<3x3x4x128xbf16, #tpu.memory_space<vmem>>, %arg4: memref<1x128xf32, #tpu.memory_space<vmem>>, %arg5: memref<1x128xf32, #tpu.memory_space<vmem>>, %arg6: memref<1x128xf32, #tpu.memory_space<vmem>>, %arg7: memref<1x7x14x128xf32, #tpu.memory_space<vmem>>) attributes {dimension_semantics = [#tpu.dimension_semantics<parallel>, #tpu.dimension_semantics<parallel>], iteration_bounds = array<i64: 2, 2>, scalar_prefetch = 0 : i64, scratch_operands = 0 : i64, tpu.core_type = #tpu.core_type<tc>, window_params = [{transform_indices = @transform_0, window_bounds = array<i64: 1, 16, 16, 4>}, {pipeline_mode = #tpu.pipeline_mode<synchronous>, transform_indices = @transform_1, window_bounds = array<i64: 3, 3, 4, 128>}, {pipeline_mode = #tpu.pipeline_mode<synchronous>, transform_indices = @transform_2, window_bounds = array<i64: 1, 128>}, {pipeline_mode = #tpu.pipeline_mode<synchronous>, transform_indices = @transform_3, window_bounds = array<i64: 1, 128>}, {pipeline_mode = #tpu.pipeline_mode<synchronous>, transform_indices = @transform_4, window_bounds = array<i64: 1, 128>}, {transform_indices = @transform_5, window_bounds = array<i64: 1, 7, 14, 128>}]} {
    %c7_i32 = arith.constant 7 : i32
    %0 = arith.muli %arg1, %c7_i32 : i32
    %c0 = arith.constant 0 : index
    %c0_0 = arith.constant 0 : index
    %c0_1 = arith.constant 0 : index
    %c0_2 = arith.constant 0 : index
    %1 = vector.load %arg3[%c0, %c0_0, %c0_1, %c0_2] : memref<3x3x4x128xbf16, #tpu.memory_space<vmem>>, vector<1x1x4x128xbf16>
    %2 = vector.shape_cast %1 : vector<1x1x4x128xbf16> to vector<4x128xbf16>
    %c0_3 = arith.constant 0 : index
    %c1 = arith.constant 1 : index
    %c0_4 = arith.constant 0 : index
    %c0_5 = arith.constant 0 : index
    %3 = vector.load %arg3[%c0_3, %c1, %c0_4, %c0_5] : memref<3x3x4x128xbf16, #tpu.memory_space<vmem>>, vector<1x1x4x128xbf16>
    %4 = vector.shape_cast %3 : vector<1x1x4x128xbf16> to vector<4x128xbf16>
    %c0_6 = arith.constant 0 : index
    %c2 = arith.constant 2 : index
    %c0_7 = arith.constant 0 : index
    %c0_8 = arith.constant 0 : index
    %5 = vector.load %arg3[%c0_6, %c2, %c0_7, %c0_8] : memref<3x3x4x128xbf16, #tpu.memory_space<vmem>>, vector<1x1x4x128xbf16>
    %6 = vector.shape_cast %5 : vector<1x1x4x128xbf16> to vector<4x128xbf16>
    %c1_9 = arith.constant 1 : index
    %c0_10 = arith.constant 0 : index
    %c0_11 = arith.constant 0 : index
    %c0_12 = arith.constant 0 : index
    %7 = vector.load %arg3[%c1_9, %c0_10, %c0_11, %c0_12] : memref<3x3x4x128xbf16, #tpu.memory_space<vmem>>, vector<1x1x4x128xbf16>
    %8 = vector.shape_cast %7 : vector<1x1x4x128xbf16> to vector<4x128xbf16>
    %c1_13 = arith.constant 1 : index
    %c1_14 = arith.constant 1 : index
    %c0_15 = arith.constant 0 : index
    %c0_16 = arith.constant 0 : index
    %9 = vector.load %arg3[%c1_13, %c1_14, %c0_15, %c0_16] : memref<3x3x4x128xbf16, #tpu.memory_space<vmem>>, vector<1x1x4x128xbf16>
    %10 = vector.shape_cast %9 : vector<1x1x4x128xbf16> to vector<4x128xbf16>
    %c1_17 = arith.constant 1 : index
    %c2_18 = arith.constant 2 : index
    %c0_19 = arith.constant 0 : index
    %c0_20 = arith.constant 0 : index
    %11 = vector.load %arg3[%c1_17, %c2_18, %c0_19, %c0_20] : memref<3x3x4x128xbf16, #tpu.memory_space<vmem>>, vector<1x1x4x128xbf16>
    %12 = vector.shape_cast %11 : vector<1x1x4x128xbf16> to vector<4x128xbf16>
    %c2_21 = arith.constant 2 : index
    %c0_22 = arith.constant 0 : index
    %c0_23 = arith.constant 0 : index
    %c0_24 = arith.constant 0 : index
    %13 = vector.load %arg3[%c2_21, %c0_22, %c0_23, %c0_24] : memref<3x3x4x128xbf16, #tpu.memory_space<vmem>>, vector<1x1x4x128xbf16>
    %14 = vector.shape_cast %13 : vector<1x1x4x128xbf16> to vector<4x128xbf16>
    %c2_25 = arith.constant 2 : index
    %c1_26 = arith.constant 1 : index
    %c0_27 = arith.constant 0 : index
    %c0_28 = arith.constant 0 : index
    %15 = vector.load %arg3[%c2_25, %c1_26, %c0_27, %c0_28] : memref<3x3x4x128xbf16, #tpu.memory_space<vmem>>, vector<1x1x4x128xbf16>
    %16 = vector.shape_cast %15 : vector<1x1x4x128xbf16> to vector<4x128xbf16>
    %c2_29 = arith.constant 2 : index
    %c2_30 = arith.constant 2 : index
    %c0_31 = arith.constant 0 : index
    %c0_32 = arith.constant 0 : index
    %17 = vector.load %arg3[%c2_29, %c2_30, %c0_31, %c0_32] : memref<3x3x4x128xbf16, #tpu.memory_space<vmem>>, vector<1x1x4x128xbf16>
    %18 = vector.shape_cast %17 : vector<1x1x4x128xbf16> to vector<4x128xbf16>
    %c0_33 = arith.constant 0 : index
    %c0_34 = arith.constant 0 : index
    %19 = vector.load %arg4[%c0_33, %c0_34] : memref<1x128xf32, #tpu.memory_space<vmem>>, vector<1x128xf32>
    %c0_35 = arith.constant 0 : index
    %c0_36 = arith.constant 0 : index
    %20 = vector.load %arg5[%c0_35, %c0_36] : memref<1x128xf32, #tpu.memory_space<vmem>>, vector<1x128xf32>
    %c0_37 = arith.constant 0 : index
    %c0_38 = arith.constant 0 : index
    %21 = vector.load %arg6[%c0_37, %c0_38] : memref<1x128xf32, #tpu.memory_space<vmem>>, vector<1x128xf32>
    %c0_i32 = arith.constant 0 : i32
    %22 = arith.addi %0, %c0_i32 : i32
    %c0_39 = arith.constant 0 : index
    %23 = arith.index_cast %22 : i32 to index
    %c0_40 = arith.constant 0 : index
    %c0_41 = arith.constant 0 : index
    %24 = vector.load %arg2[%c0_39, %23, %c0_40, %c0_41] : memref<1x16x16x4xbf16, #tpu.memory_space<vmem>>, vector<1x1x16x4xbf16>
    %25 = vector.shape_cast %24 : vector<1x1x16x4xbf16> to vector<16x4xbf16>
    %c1_i32 = arith.constant 1 : i32
    %26 = arith.addi %0, %c1_i32 : i32
    %c0_42 = arith.constant 0 : index
    %27 = arith.index_cast %26 : i32 to index
    %c0_43 = arith.constant 0 : index
    %c0_44 = arith.constant 0 : index
    %28 = vector.load %arg2[%c0_42, %27, %c0_43, %c0_44] : memref<1x16x16x4xbf16, #tpu.memory_space<vmem>>, vector<1x1x16x4xbf16>
    %29 = vector.shape_cast %28 : vector<1x1x16x4xbf16> to vector<16x4xbf16>
    %c2_i32 = arith.constant 2 : i32
    %30 = arith.addi %0, %c2_i32 : i32
    %c0_45 = arith.constant 0 : index
    %31 = arith.index_cast %30 : i32 to index
    %c0_46 = arith.constant 0 : index
    %c0_47 = arith.constant 0 : index
    %32 = vector.load %arg2[%c0_45, %31, %c0_46, %c0_47] : memref<1x16x16x4xbf16, #tpu.memory_space<vmem>>, vector<1x1x16x4xbf16>
    %33 = vector.shape_cast %32 : vector<1x1x16x4xbf16> to vector<16x4xbf16>
    %c3_i32 = arith.constant 3 : i32
    %34 = arith.addi %0, %c3_i32 : i32
    %c0_48 = arith.constant 0 : index
    %35 = arith.index_cast %34 : i32 to index
    %c0_49 = arith.constant 0 : index
    %c0_50 = arith.constant 0 : index
    %36 = vector.load %arg2[%c0_48, %35, %c0_49, %c0_50] : memref<1x16x16x4xbf16, #tpu.memory_space<vmem>>, vector<1x1x16x4xbf16>
    %37 = vector.shape_cast %36 : vector<1x1x16x4xbf16> to vector<16x4xbf16>
    %c4_i32 = arith.constant 4 : i32
    %38 = arith.addi %0, %c4_i32 : i32
    %c0_51 = arith.constant 0 : index
    %39 = arith.index_cast %38 : i32 to index
    %c0_52 = arith.constant 0 : index
    %c0_53 = arith.constant 0 : index
    %40 = vector.load %arg2[%c0_51, %39, %c0_52, %c0_53] : memref<1x16x16x4xbf16, #tpu.memory_space<vmem>>, vector<1x1x16x4xbf16>
    %41 = vector.shape_cast %40 : vector<1x1x16x4xbf16> to vector<16x4xbf16>
    %c5_i32 = arith.constant 5 : i32
    %42 = arith.addi %0, %c5_i32 : i32
    %c0_54 = arith.constant 0 : index
    %43 = arith.index_cast %42 : i32 to index
    %c0_55 = arith.constant 0 : index
    %c0_56 = arith.constant 0 : index
    %44 = vector.load %arg2[%c0_54, %43, %c0_55, %c0_56] : memref<1x16x16x4xbf16, #tpu.memory_space<vmem>>, vector<1x1x16x4xbf16>
    %45 = vector.shape_cast %44 : vector<1x1x16x4xbf16> to vector<16x4xbf16>
    %c6_i32 = arith.constant 6 : i32
    %46 = arith.addi %0, %c6_i32 : i32
    %c0_57 = arith.constant 0 : index
    %47 = arith.index_cast %46 : i32 to index
    %c0_58 = arith.constant 0 : index
    %c0_59 = arith.constant 0 : index
    %48 = vector.load %arg2[%c0_57, %47, %c0_58, %c0_59] : memref<1x16x16x4xbf16, #tpu.memory_space<vmem>>, vector<1x1x16x4xbf16>
    %49 = vector.shape_cast %48 : vector<1x1x16x4xbf16> to vector<16x4xbf16>
    %c7_i32_60 = arith.constant 7 : i32
    %50 = arith.addi %0, %c7_i32_60 : i32
    %c0_61 = arith.constant 0 : index
    %51 = arith.index_cast %50 : i32 to index
    %c0_62 = arith.constant 0 : index
    %c0_63 = arith.constant 0 : index
    %52 = vector.load %arg2[%c0_61, %51, %c0_62, %c0_63] : memref<1x16x16x4xbf16, #tpu.memory_space<vmem>>, vector<1x1x16x4xbf16>
    %53 = vector.shape_cast %52 : vector<1x1x16x4xbf16> to vector<16x4xbf16>
    %c8_i32 = arith.constant 8 : i32
    %54 = arith.addi %0, %c8_i32 : i32
    %c0_64 = arith.constant 0 : index
    %55 = arith.index_cast %54 : i32 to index
    %c0_65 = arith.constant 0 : index
    %c0_66 = arith.constant 0 : index
    %56 = vector.load %arg2[%c0_64, %55, %c0_65, %c0_66] : memref<1x16x16x4xbf16, #tpu.memory_space<vmem>>, vector<1x1x16x4xbf16>
    %57 = vector.shape_cast %56 : vector<1x1x16x4xbf16> to vector<16x4xbf16>
    %cst = arith.constant 0.000000e+00 : f32
    %58 = vector.broadcast %cst : f32 to vector<14x128xf32>
    %59 = vector.extract_strided_slice %25 {offsets = [0, 0], sizes = [14, 4], strides = [1, 1]} : vector<16x4xbf16> to vector<14x4xbf16>
    %cst_67 = arith.constant dense<0.000000e+00> : vector<14x128xf32>
    %60 = tpu.matmul %59, %2, %cst_67 {dimension_numbers = #tpu.dot_dimension_numbers<[1], [0], [0], [1], [0, 0, 1, 1], [], []>} : vector<14x4xbf16>, vector<4x128xbf16>, vector<14x128xf32> -> vector<14x128xf32>
    %61 = arith.addf %58, %60 : vector<14x128xf32>
    %62 = vector.extract_strided_slice %25 {offsets = [1, 0], sizes = [14, 4], strides = [1, 1]} : vector<16x4xbf16> to vector<14x4xbf16>
    %cst_68 = arith.constant dense<0.000000e+00> : vector<14x128xf32>
    %63 = tpu.matmul %62, %4, %cst_68 {dimension_numbers = #tpu.dot_dimension_numbers<[1], [0], [0], [1], [0, 0, 1, 1], [], []>} : vector<14x4xbf16>, vector<4x128xbf16>, vector<14x128xf32> -> vector<14x128xf32>
    %64 = arith.addf %61, %63 : vector<14x128xf32>
    %65 = vector.extract_strided_slice %25 {offsets = [2, 0], sizes = [14, 4], strides = [1, 1]} : vector<16x4xbf16> to vector<14x4xbf16>
    %cst_69 = arith.constant dense<0.000000e+00> : vector<14x128xf32>
    %66 = tpu.matmul %65, %6, %cst_69 {dimension_numbers = #tpu.dot_dimension_numbers<[1], [0], [0], [1], [0, 0, 1, 1], [], []>} : vector<14x4xbf16>, vector<4x128xbf16>, vector<14x128xf32> -> vector<14x128xf32>
    %67 = arith.addf %64, %66 : vector<14x128xf32>
    %68 = vector.extract_strided_slice %29 {offsets = [0, 0], sizes = [14, 4], strides = [1, 1]} : vector<16x4xbf16> to vector<14x4xbf16>
    %cst_70 = arith.constant dense<0.000000e+00> : vector<14x128xf32>
    %69 = tpu.matmul %68, %8, %cst_70 {dimension_numbers = #tpu.dot_dimension_numbers<[1], [0], [0], [1], [0, 0, 1, 1], [], []>} : vector<14x4xbf16>, vector<4x128xbf16>, vector<14x128xf32> -> vector<14x128xf32>
    %70 = arith.addf %67, %69 : vector<14x128xf32>
    %71 = vector.extract_strided_slice %29 {offsets = [1, 0], sizes = [14, 4], strides = [1, 1]} : vector<16x4xbf16> to vector<14x4xbf16>
    %cst_71 = arith.constant dense<0.000000e+00> : vector<14x128xf32>
    %72 = tpu.matmul %71, %10, %cst_71 {dimension_numbers = #tpu.dot_dimension_numbers<[1], [0], [0], [1], [0, 0, 1, 1], [], []>} : vector<14x4xbf16>, vector<4x128xbf16>, vector<14x128xf32> -> vector<14x128xf32>
    %73 = arith.addf %70, %72 : vector<14x128xf32>
    %74 = vector.extract_strided_slice %29 {offsets = [2, 0], sizes = [14, 4], strides = [1, 1]} : vector<16x4xbf16> to vector<14x4xbf16>
    %cst_72 = arith.constant dense<0.000000e+00> : vector<14x128xf32>
    %75 = tpu.matmul %74, %12, %cst_72 {dimension_numbers = #tpu.dot_dimension_numbers<[1], [0], [0], [1], [0, 0, 1, 1], [], []>} : vector<14x4xbf16>, vector<4x128xbf16>, vector<14x128xf32> -> vector<14x128xf32>
    %76 = arith.addf %73, %75 : vector<14x128xf32>
    %77 = vector.extract_strided_slice %33 {offsets = [0, 0], sizes = [14, 4], strides = [1, 1]} : vector<16x4xbf16> to vector<14x4xbf16>
    %cst_73 = arith.constant dense<0.000000e+00> : vector<14x128xf32>
    %78 = tpu.matmul %77, %14, %cst_73 {dimension_numbers = #tpu.dot_dimension_numbers<[1], [0], [0], [1], [0, 0, 1, 1], [], []>} : vector<14x4xbf16>, vector<4x128xbf16>, vector<14x128xf32> -> vector<14x128xf32>
    %79 = arith.addf %76, %78 : vector<14x128xf32>
    %80 = vector.extract_strided_slice %33 {offsets = [1, 0], sizes = [14, 4], strides = [1, 1]} : vector<16x4xbf16> to vector<14x4xbf16>
    %cst_74 = arith.constant dense<0.000000e+00> : vector<14x128xf32>
    %81 = tpu.matmul %80, %16, %cst_74 {dimension_numbers = #tpu.dot_dimension_numbers<[1], [0], [0], [1], [0, 0, 1, 1], [], []>} : vector<14x4xbf16>, vector<4x128xbf16>, vector<14x128xf32> -> vector<14x128xf32>
    %82 = arith.addf %79, %81 : vector<14x128xf32>
    %83 = vector.extract_strided_slice %33 {offsets = [2, 0], sizes = [14, 4], strides = [1, 1]} : vector<16x4xbf16> to vector<14x4xbf16>
    %cst_75 = arith.constant dense<0.000000e+00> : vector<14x128xf32>
    %84 = tpu.matmul %83, %18, %cst_75 {dimension_numbers = #tpu.dot_dimension_numbers<[1], [0], [0], [1], [0, 0, 1, 1], [], []>} : vector<14x4xbf16>, vector<4x128xbf16>, vector<14x128xf32> -> vector<14x128xf32>
    %85 = arith.addf %82, %84 : vector<14x128xf32>
    %86 = vector.broadcast %19 : vector<1x128xf32> to vector<14x128xf32>
    %87 = arith.addf %85, %86 : vector<14x128xf32>
    %cst_76 = arith.constant 0.000000e+00 : f32
    %88 = vector.broadcast %cst_76 : f32 to vector<14x128xf32>
    %89 = arith.maximumf %87, %88 : vector<14x128xf32>
    %90 = vector.broadcast %20 : vector<1x128xf32> to vector<14x128xf32>
    %91 = arith.mulf %89, %90 : vector<14x128xf32>
    %92 = vector.broadcast %21 : vector<1x128xf32> to vector<14x128xf32>
    %93 = arith.addf %91, %92 : vector<14x128xf32>
    %c0_77 = arith.constant 0 : index
    %c0_78 = arith.constant 0 : index
    %c0_79 = arith.constant 0 : index
    %c0_80 = arith.constant 0 : index
    %94 = vector.load %arg7[%c0_77, %c0_78, %c0_79, %c0_80] : memref<1x7x14x128xf32, #tpu.memory_space<vmem>>, vector<1x1x14x128xf32>
    %95 = vector.shape_cast %94 : vector<1x1x14x128xf32> to vector<14x128xf32>
    %96 = vector.shape_cast %93 : vector<14x128xf32> to vector<1x1x14x128xf32>
    tpu.vector_store %arg7[%c0_77, %c0_78, %c0_79, %c0_80], %96 {strides = array<i32>} : memref<1x7x14x128xf32, #tpu.memory_space<vmem>>, vector<1x1x14x128xf32>,
    %cst_81 = arith.constant 0.000000e+00 : f32
    %97 = vector.broadcast %cst_81 : f32 to vector<14x128xf32>
    %98 = vector.extract_strided_slice %29 {offsets = [0, 0], sizes = [14, 4], strides = [1, 1]} : vector<16x4xbf16> to vector<14x4xbf16>
    %cst_82 = arith.constant dense<0.000000e+00> : vector<14x128xf32>
    %99 = tpu.matmul %98, %2, %cst_82 {dimension_numbers = #tpu.dot_dimension_numbers<[1], [0], [0], [1], [0, 0, 1, 1], [], []>} : vector<14x4xbf16>, vector<4x128xbf16>, vector<14x128xf32> -> vector<14x128xf32>
    %100 = arith.addf %97, %99 : vector<14x128xf32>
    %101 = vector.extract_strided_slice %29 {offsets = [1, 0], sizes = [14, 4], strides = [1, 1]} : vector<16x4xbf16> to vector<14x4xbf16>
    %cst_83 = arith.constant dense<0.000000e+00> : vector<14x128xf32>
    %102 = tpu.matmul %101, %4, %cst_83 {dimension_numbers = #tpu.dot_dimension_numbers<[1], [0], [0], [1], [0, 0, 1, 1], [], []>} : vector<14x4xbf16>, vector<4x128xbf16>, vector<14x128xf32> -> vector<14x128xf32>
    %103 = arith.addf %100, %102 : vector<14x128xf32>
    %104 = vector.extract_strided_slice %29 {offsets = [2, 0], sizes = [14, 4], strides = [1, 1]} : vector<16x4xbf16> to vector<14x4xbf16>
    %cst_84 = arith.constant dense<0.000000e+00> : vector<14x128xf32>
    %105 = tpu.matmul %104, %6, %cst_84 {dimension_numbers = #tpu.dot_dimension_numbers<[1], [0], [0], [1], [0, 0, 1, 1], [], []>} : vector<14x4xbf16>, vector<4x128xbf16>, vector<14x128xf32> -> vector<14x128xf32>
    %106 = arith.addf %103, %105 : vector<14x128xf32>
    %107 = vector.extract_strided_slice %33 {offsets = [0, 0], sizes = [14, 4], strides = [1, 1]} : vector<16x4xbf16> to vector<14x4xbf16>
    %cst_85 = arith.constant dense<0.000000e+00> : vector<14x128xf32>
    %108 = tpu.matmul %107, %8, %cst_85 {dimension_numbers = #tpu.dot_dimension_numbers<[1], [0], [0], [1], [0, 0, 1, 1], [], []>} : vector<14x4xbf16>, vector<4x128xbf16>, vector<14x128xf32> -> vector<14x128xf32>
    %109 = arith.addf %106, %108 : vector<14x128xf32>
    %110 = vector.extract_strided_slice %33 {offsets = [1, 0], sizes = [14, 4], strides = [1, 1]} : vector<16x4xbf16> to vector<14x4xbf16>
    %cst_86 = arith.constant dense<0.000000e+00> : vector<14x128xf32>
    %111 = tpu.matmul %110, %10, %cst_86 {dimension_numbers = #tpu.dot_dimension_numbers<[1], [0], [0], [1], [0, 0, 1, 1], [], []>} : vector<14x4xbf16>, vector<4x128xbf16>, vector<14x128xf32> -> vector<14x128xf32>
    %112 = arith.addf %109, %111 : vector<14x128xf32>
    %113 = vector.extract_strided_slice %33 {offsets = [2, 0], sizes = [14, 4], strides = [1, 1]} : vector<16x4xbf16> to vector<14x4xbf16>
    %cst_87 = arith.constant dense<0.000000e+00> : vector<14x128xf32>
    %114 = tpu.matmul %113, %12, %cst_87 {dimension_numbers = #tpu.dot_dimension_numbers<[1], [0], [0], [1], [0, 0, 1, 1], [], []>} : vector<14x4xbf16>, vector<4x128xbf16>, vector<14x128xf32> -> vector<14x128xf32>
    %115 = arith.addf %112, %114 : vector<14x128xf32>
    %116 = vector.extract_strided_slice %37 {offsets = [0, 0], sizes = [14, 4], strides = [1, 1]} : vector<16x4xbf16> to vector<14x4xbf16>
    %cst_88 = arith.constant dense<0.000000e+00> : vector<14x128xf32>
    %117 = tpu.matmul %116, %14, %cst_88 {dimension_numbers = #tpu.dot_dimension_numbers<[1], [0], [0], [1], [0, 0, 1, 1], [], []>} : vector<14x4xbf16>, vector<4x128xbf16>, vector<14x128xf32> -> vector<14x128xf32>
    %118 = arith.addf %115, %117 : vector<14x128xf32>
    %119 = vector.extract_strided_slice %37 {offsets = [1, 0], sizes = [14, 4], strides = [1, 1]} : vector<16x4xbf16> to vector<14x4xbf16>
    %cst_89 = arith.constant dense<0.000000e+00> : vector<14x128xf32>
    %120 = tpu.matmul %119, %16, %cst_89 {dimension_numbers = #tpu.dot_dimension_numbers<[1], [0], [0], [1], [0, 0, 1, 1], [], []>} : vector<14x4xbf16>, vector<4x128xbf16>, vector<14x128xf32> -> vector<14x128xf32>
    %121 = arith.addf %118, %120 : vector<14x128xf32>
    %122 = vector.extract_strided_slice %37 {offsets = [2, 0], sizes = [14, 4], strides = [1, 1]} : vector<16x4xbf16> to vector<14x4xbf16>
    %cst_90 = arith.constant dense<0.000000e+00> : vector<14x128xf32>
    %123 = tpu.matmul %122, %18, %cst_90 {dimension_numbers = #tpu.dot_dimension_numbers<[1], [0], [0], [1], [0, 0, 1, 1], [], []>} : vector<14x4xbf16>, vector<4x128xbf16>, vector<14x128xf32> -> vector<14x128xf32>
    %124 = arith.addf %121, %123 : vector<14x128xf32>
    %125 = vector.broadcast %19 : vector<1x128xf32> to vector<14x128xf32>
    %126 = arith.addf %124, %125 : vector<14x128xf32>
    %cst_91 = arith.constant 0.000000e+00 : f32
    %127 = vector.broadcast %cst_91 : f32 to vector<14x128xf32>
    %128 = arith.maximumf %126, %127 : vector<14x128xf32>
    %129 = vector.broadcast %20 : vector<1x128xf32> to vector<14x128xf32>
    %130 = arith.mulf %128, %129 : vector<14x128xf32>
    %131 = vector.broadcast %21 : vector<1x128xf32> to vector<14x128xf32>
    %132 = arith.addf %130, %131 : vector<14x128xf32>
    %c0_92 = arith.constant 0 : index
    %c1_93 = arith.constant 1 : index
    %c0_94 = arith.constant 0 : index
    %c0_95 = arith.constant 0 : index
    %133 = vector.load %arg7[%c0_92, %c1_93, %c0_94, %c0_95] : memref<1x7x14x128xf32, #tpu.memory_space<vmem>>, vector<1x1x14x128xf32>
    %134 = vector.shape_cast %133 : vector<1x1x14x128xf32> to vector<14x128xf32>
    %135 = vector.shape_cast %132 : vector<14x128xf32> to vector<1x1x14x128xf32>
    tpu.vector_store %arg7[%c0_92, %c1_93, %c0_94, %c0_95], %135 {strides = array<i32>} : memref<1x7x14x128xf32, #tpu.memory_space<vmem>>, vector<1x1x14x128xf32>,
    %cst_96 = arith.constant 0.000000e+00 : f32
    %136 = vector.broadcast %cst_96 : f32 to vector<14x128xf32>
    %137 = vector.extract_strided_slice %33 {offsets = [0, 0], sizes = [14, 4], strides = [1, 1]} : vector<16x4xbf16> to vector<14x4xbf16>
    %cst_97 = arith.constant dense<0.000000e+00> : vector<14x128xf32>
    %138 = tpu.matmul %137, %2, %cst_97 {dimension_numbers = #tpu.dot_dimension_numbers<[1], [0], [0], [1], [0, 0, 1, 1], [], []>} : vector<14x4xbf16>, vector<4x128xbf16>, vector<14x128xf32> -> vector<14x128xf32>
    %139 = arith.addf %136, %138 : vector<14x128xf32>
    %140 = vector.extract_strided_slice %33 {offsets = [1, 0], sizes = [14, 4], strides = [1, 1]} : vector<16x4xbf16> to vector<14x4xbf16>
    %cst_98 = arith.constant dense<0.000000e+00> : vector<14x128xf32>
    %141 = tpu.matmul %140, %4, %cst_98 {dimension_numbers = #tpu.dot_dimension_numbers<[1], [0], [0], [1], [0, 0, 1, 1], [], []>} : vector<14x4xbf16>, vector<4x128xbf16>, vector<14x128xf32> -> vector<14x128xf32>
    %142 = arith.addf %139, %141 : vector<14x128xf32>
    %143 = vector.extract_strided_slice %33 {offsets = [2, 0], sizes = [14, 4], strides = [1, 1]} : vector<16x4xbf16> to vector<14x4xbf16>
    %cst_99 = arith.constant dense<0.000000e+00> : vector<14x128xf32>
    %144 = tpu.matmul %143, %6, %cst_99 {dimension_numbers = #tpu.dot_dimension_numbers<[1], [0], [0], [1], [0, 0, 1, 1], [], []>} : vector<14x4xbf16>, vector<4x128xbf16>, vector<14x128xf32> -> vector<14x128xf32>
    %145 = arith.addf %142, %144 : vector<14x128xf32>
    %146 = vector.extract_strided_slice %37 {offsets = [0, 0], sizes = [14, 4], strides = [1, 1]} : vector<16x4xbf16> to vector<14x4xbf16>
    %cst_100 = arith.constant dense<0.000000e+00> : vector<14x128xf32>
    %147 = tpu.matmul %146, %8, %cst_100 {dimension_numbers = #tpu.dot_dimension_numbers<[1], [0], [0], [1], [0, 0, 1, 1], [], []>} : vector<14x4xbf16>, vector<4x128xbf16>, vector<14x128xf32> -> vector<14x128xf32>
    %148 = arith.addf %145, %147 : vector<14x128xf32>
    %149 = vector.extract_strided_slice %37 {offsets = [1, 0], sizes = [14, 4], strides = [1, 1]} : vector<16x4xbf16> to vector<14x4xbf16>
    %cst_101 = arith.constant dense<0.000000e+00> : vector<14x128xf32>
    %150 = tpu.matmul %149, %10, %cst_101 {dimension_numbers = #tpu.dot_dimension_numbers<[1], [0], [0], [1], [0, 0, 1, 1], [], []>} : vector<14x4xbf16>, vector<4x128xbf16>, vector<14x128xf32> -> vector<14x128xf32>
    %151 = arith.addf %148, %150 : vector<14x128xf32>
    %152 = vector.extract_strided_slice %37 {offsets = [2, 0], sizes = [14, 4], strides = [1, 1]} : vector<16x4xbf16> to vector<14x4xbf16>
    %cst_102 = arith.constant dense<0.000000e+00> : vector<14x128xf32>
    %153 = tpu.matmul %152, %12, %cst_102 {dimension_numbers = #tpu.dot_dimension_numbers<[1], [0], [0], [1], [0, 0, 1, 1], [], []>} : vector<14x4xbf16>, vector<4x128xbf16>, vector<14x128xf32> -> vector<14x128xf32>
    %154 = arith.addf %151, %153 : vector<14x128xf32>
    %155 = vector.extract_strided_slice %41 {offsets = [0, 0], sizes = [14, 4], strides = [1, 1]} : vector<16x4xbf16> to vector<14x4xbf16>
    %cst_103 = arith.constant dense<0.000000e+00> : vector<14x128xf32>
    %156 = tpu.matmul %155, %14, %cst_103 {dimension_numbers = #tpu.dot_dimension_numbers<[1], [0], [0], [1], [0, 0, 1, 1], [], []>} : vector<14x4xbf16>, vector<4x128xbf16>, vector<14x128xf32> -> vector<14x128xf32>
    %157 = arith.addf %154, %156 : vector<14x128xf32>
    %158 = vector.extract_strided_slice %41 {offsets = [1, 0], sizes = [14, 4], strides = [1, 1]} : vector<16x4xbf16> to vector<14x4xbf16>
    %cst_104 = arith.constant dense<0.000000e+00> : vector<14x128xf32>
    %159 = tpu.matmul %158, %16, %cst_104 {dimension_numbers = #tpu.dot_dimension_numbers<[1], [0], [0], [1], [0, 0, 1, 1], [], []>} : vector<14x4xbf16>, vector<4x128xbf16>, vector<14x128xf32> -> vector<14x128xf32>
    %160 = arith.addf %157, %159 : vector<14x128xf32>
    %161 = vector.extract_strided_slice %41 {offsets = [2, 0], sizes = [14, 4], strides = [1, 1]} : vector<16x4xbf16> to vector<14x4xbf16>
    %cst_105 = arith.constant dense<0.000000e+00> : vector<14x128xf32>
    %162 = tpu.matmul %161, %18, %cst_105 {dimension_numbers = #tpu.dot_dimension_numbers<[1], [0], [0], [1], [0, 0, 1, 1], [], []>} : vector<14x4xbf16>, vector<4x128xbf16>, vector<14x128xf32> -> vector<14x128xf32>
    %163 = arith.addf %160, %162 : vector<14x128xf32>
    %164 = vector.broadcast %19 : vector<1x128xf32> to vector<14x128xf32>
    %165 = arith.addf %163, %164 : vector<14x128xf32>
    %cst_106 = arith.constant 0.000000e+00 : f32
    %166 = vector.broadcast %cst_106 : f32 to vector<14x128xf32>
    %167 = arith.maximumf %165, %166 : vector<14x128xf32>
    %168 = vector.broadcast %20 : vector<1x128xf32> to vector<14x128xf32>
    %169 = arith.mulf %167, %168 : vector<14x128xf32>
    %170 = vector.broadcast %21 : vector<1x128xf32> to vector<14x128xf32>
    %171 = arith.addf %169, %170 : vector<14x128xf32>
    %c0_107 = arith.constant 0 : index
    %c2_108 = arith.constant 2 : index
    %c0_109 = arith.constant 0 : index
    %c0_110 = arith.constant 0 : index
    %172 = vector.load %arg7[%c0_107, %c2_108, %c0_109, %c0_110] : memref<1x7x14x128xf32, #tpu.memory_space<vmem>>, vector<1x1x14x128xf32>
    %173 = vector.shape_cast %172 : vector<1x1x14x128xf32> to vector<14x128xf32>
    %174 = vector.shape_cast %171 : vector<14x128xf32> to vector<1x1x14x128xf32>
    tpu.vector_store %arg7[%c0_107, %c2_108, %c0_109, %c0_110], %174 {strides = array<i32>} : memref<1x7x14x128xf32, #tpu.memory_space<vmem>>, vector<1x1x14x128xf32>,
    %cst_111 = arith.constant 0.000000e+00 : f32
    %175 = vector.broadcast %cst_111 : f32 to vector<14x128xf32>
    %176 = vector.extract_strided_slice %37 {offsets = [0, 0], sizes = [14, 4], strides = [1, 1]} : vector<16x4xbf16> to vector<14x4xbf16>
    %cst_112 = arith.constant dense<0.000000e+00> : vector<14x128xf32>
    %177 = tpu.matmul %176, %2, %cst_112 {dimension_numbers = #tpu.dot_dimension_numbers<[1], [0], [0], [1], [0, 0, 1, 1], [], []>} : vector<14x4xbf16>, vector<4x128xbf16>, vector<14x128xf32> -> vector<14x128xf32>
    %178 = arith.addf %175, %177 : vector<14x128xf32>
    %179 = vector.extract_strided_slice %37 {offsets = [1, 0], sizes = [14, 4], strides = [1, 1]} : vector<16x4xbf16> to vector<14x4xbf16>
    %cst_113 = arith.constant dense<0.000000e+00> : vector<14x128xf32>
    %180 = tpu.matmul %179, %4, %cst_113 {dimension_numbers = #tpu.dot_dimension_numbers<[1], [0], [0], [1], [0, 0, 1, 1], [], []>} : vector<14x4xbf16>, vector<4x128xbf16>, vector<14x128xf32> -> vector<14x128xf32>
    %181 = arith.addf %178, %180 : vector<14x128xf32>
    %182 = vector.extract_strided_slice %37 {offsets = [2, 0], sizes = [14, 4], strides = [1, 1]} : vector<16x4xbf16> to vector<14x4xbf16>
    %cst_114 = arith.constant dense<0.000000e+00> : vector<14x128xf32>
    %183 = tpu.matmul %182, %6, %cst_114 {dimension_numbers = #tpu.dot_dimension_numbers<[1], [0], [0], [1], [0, 0, 1, 1], [], []>} : vector<14x4xbf16>, vector<4x128xbf16>, vector<14x128xf32> -> vector<14x128xf32>
    %184 = arith.addf %181, %183 : vector<14x128xf32>
    %185 = vector.extract_strided_slice %41 {offsets = [0, 0], sizes = [14, 4], strides = [1, 1]} : vector<16x4xbf16> to vector<14x4xbf16>
    %cst_115 = arith.constant dense<0.000000e+00> : vector<14x128xf32>
    %186 = tpu.matmul %185, %8, %cst_115 {dimension_numbers = #tpu.dot_dimension_numbers<[1], [0], [0], [1], [0, 0, 1, 1], [], []>} : vector<14x4xbf16>, vector<4x128xbf16>, vector<14x128xf32> -> vector<14x128xf32>
    %187 = arith.addf %184, %186 : vector<14x128xf32>
    %188 = vector.extract_strided_slice %41 {offsets = [1, 0], sizes = [14, 4], strides = [1, 1]} : vector<16x4xbf16> to vector<14x4xbf16>
    %cst_116 = arith.constant dense<0.000000e+00> : vector<14x128xf32>
    %189 = tpu.matmul %188, %10, %cst_116 {dimension_numbers = #tpu.dot_dimension_numbers<[1], [0], [0], [1], [0, 0, 1, 1], [], []>} : vector<14x4xbf16>, vector<4x128xbf16>, vector<14x128xf32> -> vector<14x128xf32>
    %190 = arith.addf %187, %189 : vector<14x128xf32>
    %191 = vector.extract_strided_slice %41 {offsets = [2, 0], sizes = [14, 4], strides = [1, 1]} : vector<16x4xbf16> to vector<14x4xbf16>
    %cst_117 = arith.constant dense<0.000000e+00> : vector<14x128xf32>
    %192 = tpu.matmul %191, %12, %cst_117 {dimension_numbers = #tpu.dot_dimension_numbers<[1], [0], [0], [1], [0, 0, 1, 1], [], []>} : vector<14x4xbf16>, vector<4x128xbf16>, vector<14x128xf32> -> vector<14x128xf32>
    %193 = arith.addf %190, %192 : vector<14x128xf32>
    %194 = vector.extract_strided_slice %45 {offsets = [0, 0], sizes = [14, 4], strides = [1, 1]} : vector<16x4xbf16> to vector<14x4xbf16>
    %cst_118 = arith.constant dense<0.000000e+00> : vector<14x128xf32>
    %195 = tpu.matmul %194, %14, %cst_118 {dimension_numbers = #tpu.dot_dimension_numbers<[1], [0], [0], [1], [0, 0, 1, 1], [], []>} : vector<14x4xbf16>, vector<4x128xbf16>, vector<14x128xf32> -> vector<14x128xf32>
    %196 = arith.addf %193, %195 : vector<14x128xf32>
    %197 = vector.extract_strided_slice %45 {offsets = [1, 0], sizes = [14, 4], strides = [1, 1]} : vector<16x4xbf16> to vector<14x4xbf16>
    %cst_119 = arith.constant dense<0.000000e+00> : vector<14x128xf32>
    %198 = tpu.matmul %197, %16, %cst_119 {dimension_numbers = #tpu.dot_dimension_numbers<[1], [0], [0], [1], [0, 0, 1, 1], [], []>} : vector<14x4xbf16>, vector<4x128xbf16>, vector<14x128xf32> -> vector<14x128xf32>
    %199 = arith.addf %196, %198 : vector<14x128xf32>
    %200 = vector.extract_strided_slice %45 {offsets = [2, 0], sizes = [14, 4], strides = [1, 1]} : vector<16x4xbf16> to vector<14x4xbf16>
    %cst_120 = arith.constant dense<0.000000e+00> : vector<14x128xf32>
    %201 = tpu.matmul %200, %18, %cst_120 {dimension_numbers = #tpu.dot_dimension_numbers<[1], [0], [0], [1], [0, 0, 1, 1], [], []>} : vector<14x4xbf16>, vector<4x128xbf16>, vector<14x128xf32> -> vector<14x128xf32>
    %202 = arith.addf %199, %201 : vector<14x128xf32>
    %203 = vector.broadcast %19 : vector<1x128xf32> to vector<14x128xf32>
    %204 = arith.addf %202, %203 : vector<14x128xf32>
    %cst_121 = arith.constant 0.000000e+00 : f32
    %205 = vector.broadcast %cst_121 : f32 to vector<14x128xf32>
    %206 = arith.maximumf %204, %205 : vector<14x128xf32>
    %207 = vector.broadcast %20 : vector<1x128xf32> to vector<14x128xf32>
    %208 = arith.mulf %206, %207 : vector<14x128xf32>
    %209 = vector.broadcast %21 : vector<1x128xf32> to vector<14x128xf32>
    %210 = arith.addf %208, %209 : vector<14x128xf32>
    %c0_122 = arith.constant 0 : index
    %c3 = arith.constant 3 : index
    %c0_123 = arith.constant 0 : index
    %c0_124 = arith.constant 0 : index
    %211 = vector.load %arg7[%c0_122, %c3, %c0_123, %c0_124] : memref<1x7x14x128xf32, #tpu.memory_space<vmem>>, vector<1x1x14x128xf32>
    %212 = vector.shape_cast %211 : vector<1x1x14x128xf32> to vector<14x128xf32>
    %213 = vector.shape_cast %210 : vector<14x128xf32> to vector<1x1x14x128xf32>
    tpu.vector_store %arg7[%c0_122, %c3, %c0_123, %c0_124], %213 {strides = array<i32>} : memref<1x7x14x128xf32, #tpu.memory_space<vmem>>, vector<1x1x14x128xf32>,
    %cst_125 = arith.constant 0.000000e+00 : f32
    %214 = vector.broadcast %cst_125 : f32 to vector<14x128xf32>
    %215 = vector.extract_strided_slice %41 {offsets = [0, 0], sizes = [14, 4], strides = [1, 1]} : vector<16x4xbf16> to vector<14x4xbf16>
    %cst_126 = arith.constant dense<0.000000e+00> : vector<14x128xf32>
    %216 = tpu.matmul %215, %2, %cst_126 {dimension_numbers = #tpu.dot_dimension_numbers<[1], [0], [0], [1], [0, 0, 1, 1], [], []>} : vector<14x4xbf16>, vector<4x128xbf16>, vector<14x128xf32> -> vector<14x128xf32>
    %217 = arith.addf %214, %216 : vector<14x128xf32>
    %218 = vector.extract_strided_slice %41 {offsets = [1, 0], sizes = [14, 4], strides = [1, 1]} : vector<16x4xbf16> to vector<14x4xbf16>
    %cst_127 = arith.constant dense<0.000000e+00> : vector<14x128xf32>
    %219 = tpu.matmul %218, %4, %cst_127 {dimension_numbers = #tpu.dot_dimension_numbers<[1], [0], [0], [1], [0, 0, 1, 1], [], []>} : vector<14x4xbf16>, vector<4x128xbf16>, vector<14x128xf32> -> vector<14x128xf32>
    %220 = arith.addf %217, %219 : vector<14x128xf32>
    %221 = vector.extract_strided_slice %41 {offsets = [2, 0], sizes = [14, 4], strides = [1, 1]} : vector<16x4xbf16> to vector<14x4xbf16>
    %cst_128 = arith.constant dense<0.000000e+00> : vector<14x128xf32>
    %222 = tpu.matmul %221, %6, %cst_128 {dimension_numbers = #tpu.dot_dimension_numbers<[1], [0], [0], [1], [0, 0, 1, 1], [], []>} : vector<14x4xbf16>, vector<4x128xbf16>, vector<14x128xf32> -> vector<14x128xf32>
    %223 = arith.addf %220, %222 : vector<14x128xf32>
    %224 = vector.extract_strided_slice %45 {offsets = [0, 0], sizes = [14, 4], strides = [1, 1]} : vector<16x4xbf16> to vector<14x4xbf16>
    %cst_129 = arith.constant dense<0.000000e+00> : vector<14x128xf32>
    %225 = tpu.matmul %224, %8, %cst_129 {dimension_numbers = #tpu.dot_dimension_numbers<[1], [0], [0], [1], [0, 0, 1, 1], [], []>} : vector<14x4xbf16>, vector<4x128xbf16>, vector<14x128xf32> -> vector<14x128xf32>
    %226 = arith.addf %223, %225 : vector<14x128xf32>
    %227 = vector.extract_strided_slice %45 {offsets = [1, 0], sizes = [14, 4], strides = [1, 1]} : vector<16x4xbf16> to vector<14x4xbf16>
    %cst_130 = arith.constant dense<0.000000e+00> : vector<14x128xf32>
    %228 = tpu.matmul %227, %10, %cst_130 {dimension_numbers = #tpu.dot_dimension_numbers<[1], [0], [0], [1], [0, 0, 1, 1], [], []>} : vector<14x4xbf16>, vector<4x128xbf16>, vector<14x128xf32> -> vector<14x128xf32>
    %229 = arith.addf %226, %228 : vector<14x128xf32>
    %230 = vector.extract_strided_slice %45 {offsets = [2, 0], sizes = [14, 4], strides = [1, 1]} : vector<16x4xbf16> to vector<14x4xbf16>
    %cst_131 = arith.constant dense<0.000000e+00> : vector<14x128xf32>
    %231 = tpu.matmul %230, %12, %cst_131 {dimension_numbers = #tpu.dot_dimension_numbers<[1], [0], [0], [1], [0, 0, 1, 1], [], []>} : vector<14x4xbf16>, vector<4x128xbf16>, vector<14x128xf32> -> vector<14x128xf32>
    %232 = arith.addf %229, %231 : vector<14x128xf32>
    %233 = vector.extract_strided_slice %49 {offsets = [0, 0], sizes = [14, 4], strides = [1, 1]} : vector<16x4xbf16> to vector<14x4xbf16>
    %cst_132 = arith.constant dense<0.000000e+00> : vector<14x128xf32>
    %234 = tpu.matmul %233, %14, %cst_132 {dimension_numbers = #tpu.dot_dimension_numbers<[1], [0], [0], [1], [0, 0, 1, 1], [], []>} : vector<14x4xbf16>, vector<4x128xbf16>, vector<14x128xf32> -> vector<14x128xf32>
    %235 = arith.addf %232, %234 : vector<14x128xf32>
    %236 = vector.extract_strided_slice %49 {offsets = [1, 0], sizes = [14, 4], strides = [1, 1]} : vector<16x4xbf16> to vector<14x4xbf16>
    %cst_133 = arith.constant dense<0.000000e+00> : vector<14x128xf32>
    %237 = tpu.matmul %236, %16, %cst_133 {dimension_numbers = #tpu.dot_dimension_numbers<[1], [0], [0], [1], [0, 0, 1, 1], [], []>} : vector<14x4xbf16>, vector<4x128xbf16>, vector<14x128xf32> -> vector<14x128xf32>
    %238 = arith.addf %235, %237 : vector<14x128xf32>
    %239 = vector.extract_strided_slice %49 {offsets = [2, 0], sizes = [14, 4], strides = [1, 1]} : vector<16x4xbf16> to vector<14x4xbf16>
    %cst_134 = arith.constant dense<0.000000e+00> : vector<14x128xf32>
    %240 = tpu.matmul %239, %18, %cst_134 {dimension_numbers = #tpu.dot_dimension_numbers<[1], [0], [0], [1], [0, 0, 1, 1], [], []>} : vector<14x4xbf16>, vector<4x128xbf16>, vector<14x128xf32> -> vector<14x128xf32>
    %241 = arith.addf %238, %240 : vector<14x128xf32>
    %242 = vector.broadcast %19 : vector<1x128xf32> to vector<14x128xf32>
    %243 = arith.addf %241, %242 : vector<14x128xf32>
    %cst_135 = arith.constant 0.000000e+00 : f32
    %244 = vector.broadcast %cst_135 : f32 to vector<14x128xf32>
    %245 = arith.maximumf %243, %244 : vector<14x128xf32>
    %246 = vector.broadcast %20 : vector<1x128xf32> to vector<14x128xf32>
    %247 = arith.mulf %245, %246 : vector<14x128xf32>
    %248 = vector.broadcast %21 : vector<1x128xf32> to vector<14x128xf32>
    %249 = arith.addf %247, %248 : vector<14x128xf32>
    %c0_136 = arith.constant 0 : index
    %c4 = arith.constant 4 : index
    %c0_137 = arith.constant 0 : index
    %c0_138 = arith.constant 0 : index
    %250 = vector.load %arg7[%c0_136, %c4, %c0_137, %c0_138] : memref<1x7x14x128xf32, #tpu.memory_space<vmem>>, vector<1x1x14x128xf32>
    %251 = vector.shape_cast %250 : vector<1x1x14x128xf32> to vector<14x128xf32>
    %252 = vector.shape_cast %249 : vector<14x128xf32> to vector<1x1x14x128xf32>
    tpu.vector_store %arg7[%c0_136, %c4, %c0_137, %c0_138], %252 {strides = array<i32>} : memref<1x7x14x128xf32, #tpu.memory_space<vmem>>, vector<1x1x14x128xf32>,
    %cst_139 = arith.constant 0.000000e+00 : f32
    %253 = vector.broadcast %cst_139 : f32 to vector<14x128xf32>
    %254 = vector.extract_strided_slice %45 {offsets = [0, 0], sizes = [14, 4], strides = [1, 1]} : vector<16x4xbf16> to vector<14x4xbf16>
    %cst_140 = arith.constant dense<0.000000e+00> : vector<14x128xf32>
    %255 = tpu.matmul %254, %2, %cst_140 {dimension_numbers = #tpu.dot_dimension_numbers<[1], [0], [0], [1], [0, 0, 1, 1], [], []>} : vector<14x4xbf16>, vector<4x128xbf16>, vector<14x128xf32> -> vector<14x128xf32>
    %256 = arith.addf %253, %255 : vector<14x128xf32>
    %257 = vector.extract_strided_slice %45 {offsets = [1, 0], sizes = [14, 4], strides = [1, 1]} : vector<16x4xbf16> to vector<14x4xbf16>
    %cst_141 = arith.constant dense<0.000000e+00> : vector<14x128xf32>
    %258 = tpu.matmul %257, %4, %cst_141 {dimension_numbers = #tpu.dot_dimension_numbers<[1], [0], [0], [1], [0, 0, 1, 1], [], []>} : vector<14x4xbf16>, vector<4x128xbf16>, vector<14x128xf32> -> vector<14x128xf32>
    %259 = arith.addf %256, %258 : vector<14x128xf32>
    %260 = vector.extract_strided_slice %45 {offsets = [2, 0], sizes = [14, 4], strides = [1, 1]} : vector<16x4xbf16> to vector<14x4xbf16>
    %cst_142 = arith.constant dense<0.000000e+00> : vector<14x128xf32>
    %261 = tpu.matmul %260, %6, %cst_142 {dimension_numbers = #tpu.dot_dimension_numbers<[1], [0], [0], [1], [0, 0, 1, 1], [], []>} : vector<14x4xbf16>, vector<4x128xbf16>, vector<14x128xf32> -> vector<14x128xf32>
    %262 = arith.addf %259, %261 : vector<14x128xf32>
    %263 = vector.extract_strided_slice %49 {offsets = [0, 0], sizes = [14, 4], strides = [1, 1]} : vector<16x4xbf16> to vector<14x4xbf16>
    %cst_143 = arith.constant dense<0.000000e+00> : vector<14x128xf32>
    %264 = tpu.matmul %263, %8, %cst_143 {dimension_numbers = #tpu.dot_dimension_numbers<[1], [0], [0], [1], [0, 0, 1, 1], [], []>} : vector<14x4xbf16>, vector<4x128xbf16>, vector<14x128xf32> -> vector<14x128xf32>
    %265 = arith.addf %262, %264 : vector<14x128xf32>
    %266 = vector.extract_strided_slice %49 {offsets = [1, 0], sizes = [14, 4], strides = [1, 1]} : vector<16x4xbf16> to vector<14x4xbf16>
    %cst_144 = arith.constant dense<0.000000e+00> : vector<14x128xf32>
    %267 = tpu.matmul %266, %10, %cst_144 {dimension_numbers = #tpu.dot_dimension_numbers<[1], [0], [0], [1], [0, 0, 1, 1], [], []>} : vector<14x4xbf16>, vector<4x128xbf16>, vector<14x128xf32> -> vector<14x128xf32>
    %268 = arith.addf %265, %267 : vector<14x128xf32>
    %269 = vector.extract_strided_slice %49 {offsets = [2, 0], sizes = [14, 4], strides = [1, 1]} : vector<16x4xbf16> to vector<14x4xbf16>
    %cst_145 = arith.constant dense<0.000000e+00> : vector<14x128xf32>
    %270 = tpu.matmul %269, %12, %cst_145 {dimension_numbers = #tpu.dot_dimension_numbers<[1], [0], [0], [1], [0, 0, 1, 1], [], []>} : vector<14x4xbf16>, vector<4x128xbf16>, vector<14x128xf32> -> vector<14x128xf32>
    %271 = arith.addf %268, %270 : vector<14x128xf32>
    %272 = vector.extract_strided_slice %53 {offsets = [0, 0], sizes = [14, 4], strides = [1, 1]} : vector<16x4xbf16> to vector<14x4xbf16>
    %cst_146 = arith.constant dense<0.000000e+00> : vector<14x128xf32>
    %273 = tpu.matmul %272, %14, %cst_146 {dimension_numbers = #tpu.dot_dimension_numbers<[1], [0], [0], [1], [0, 0, 1, 1], [], []>} : vector<14x4xbf16>, vector<4x128xbf16>, vector<14x128xf32> -> vector<14x128xf32>
    %274 = arith.addf %271, %273 : vector<14x128xf32>
    %275 = vector.extract_strided_slice %53 {offsets = [1, 0], sizes = [14, 4], strides = [1, 1]} : vector<16x4xbf16> to vector<14x4xbf16>
    %cst_147 = arith.constant dense<0.000000e+00> : vector<14x128xf32>
    %276 = tpu.matmul %275, %16, %cst_147 {dimension_numbers = #tpu.dot_dimension_numbers<[1], [0], [0], [1], [0, 0, 1, 1], [], []>} : vector<14x4xbf16>, vector<4x128xbf16>, vector<14x128xf32> -> vector<14x128xf32>
    %277 = arith.addf %274, %276 : vector<14x128xf32>
    %278 = vector.extract_strided_slice %53 {offsets = [2, 0], sizes = [14, 4], strides = [1, 1]} : vector<16x4xbf16> to vector<14x4xbf16>
    %cst_148 = arith.constant dense<0.000000e+00> : vector<14x128xf32>
    %279 = tpu.matmul %278, %18, %cst_148 {dimension_numbers = #tpu.dot_dimension_numbers<[1], [0], [0], [1], [0, 0, 1, 1], [], []>} : vector<14x4xbf16>, vector<4x128xbf16>, vector<14x128xf32> -> vector<14x128xf32>
    %280 = arith.addf %277, %279 : vector<14x128xf32>
    %281 = vector.broadcast %19 : vector<1x128xf32> to vector<14x128xf32>
    %282 = arith.addf %280, %281 : vector<14x128xf32>
    %cst_149 = arith.constant 0.000000e+00 : f32
    %283 = vector.broadcast %cst_149 : f32 to vector<14x128xf32>
    %284 = arith.maximumf %282, %283 : vector<14x128xf32>
    %285 = vector.broadcast %20 : vector<1x128xf32> to vector<14x128xf32>
    %286 = arith.mulf %284, %285 : vector<14x128xf32>
    %287 = vector.broadcast %21 : vector<1x128xf32> to vector<14x128xf32>
    %288 = arith.addf %286, %287 : vector<14x128xf32>
    %c0_150 = arith.constant 0 : index
    %c5 = arith.constant 5 : index
    %c0_151 = arith.constant 0 : index
    %c0_152 = arith.constant 0 : index
    %289 = vector.load %arg7[%c0_150, %c5, %c0_151, %c0_152] : memref<1x7x14x128xf32, #tpu.memory_space<vmem>>, vector<1x1x14x128xf32>
    %290 = vector.shape_cast %289 : vector<1x1x14x128xf32> to vector<14x128xf32>
    %291 = vector.shape_cast %288 : vector<14x128xf32> to vector<1x1x14x128xf32>
    tpu.vector_store %arg7[%c0_150, %c5, %c0_151, %c0_152], %291 {strides = array<i32>} : memref<1x7x14x128xf32, #tpu.memory_space<vmem>>, vector<1x1x14x128xf32>,
    %cst_153 = arith.constant 0.000000e+00 : f32
    %292 = vector.broadcast %cst_153 : f32 to vector<14x128xf32>
    %293 = vector.extract_strided_slice %49 {offsets = [0, 0], sizes = [14, 4], strides = [1, 1]} : vector<16x4xbf16> to vector<14x4xbf16>
    %cst_154 = arith.constant dense<0.000000e+00> : vector<14x128xf32>
    %294 = tpu.matmul %293, %2, %cst_154 {dimension_numbers = #tpu.dot_dimension_numbers<[1], [0], [0], [1], [0, 0, 1, 1], [], []>} : vector<14x4xbf16>, vector<4x128xbf16>, vector<14x128xf32> -> vector<14x128xf32>
    %295 = arith.addf %292, %294 : vector<14x128xf32>
    %296 = vector.extract_strided_slice %49 {offsets = [1, 0], sizes = [14, 4], strides = [1, 1]} : vector<16x4xbf16> to vector<14x4xbf16>
    %cst_155 = arith.constant dense<0.000000e+00> : vector<14x128xf32>
    %297 = tpu.matmul %296, %4, %cst_155 {dimension_numbers = #tpu.dot_dimension_numbers<[1], [0], [0], [1], [0, 0, 1, 1], [], []>} : vector<14x4xbf16>, vector<4x128xbf16>, vector<14x128xf32> -> vector<14x128xf32>
    %298 = arith.addf %295, %297 : vector<14x128xf32>
    %299 = vector.extract_strided_slice %49 {offsets = [2, 0], sizes = [14, 4], strides = [1, 1]} : vector<16x4xbf16> to vector<14x4xbf16>
    %cst_156 = arith.constant dense<0.000000e+00> : vector<14x128xf32>
    %300 = tpu.matmul %299, %6, %cst_156 {dimension_numbers = #tpu.dot_dimension_numbers<[1], [0], [0], [1], [0, 0, 1, 1], [], []>} : vector<14x4xbf16>, vector<4x128xbf16>, vector<14x128xf32> -> vector<14x128xf32>
    %301 = arith.addf %298, %300 : vector<14x128xf32>
    %302 = vector.extract_strided_slice %53 {offsets = [0, 0], sizes = [14, 4], strides = [1, 1]} : vector<16x4xbf16> to vector<14x4xbf16>
    %cst_157 = arith.constant dense<0.000000e+00> : vector<14x128xf32>
    %303 = tpu.matmul %302, %8, %cst_157 {dimension_numbers = #tpu.dot_dimension_numbers<[1], [0], [0], [1], [0, 0, 1, 1], [], []>} : vector<14x4xbf16>, vector<4x128xbf16>, vector<14x128xf32> -> vector<14x128xf32>
    %304 = arith.addf %301, %303 : vector<14x128xf32>
    %305 = vector.extract_strided_slice %53 {offsets = [1, 0], sizes = [14, 4], strides = [1, 1]} : vector<16x4xbf16> to vector<14x4xbf16>
    %cst_158 = arith.constant dense<0.000000e+00> : vector<14x128xf32>
    %306 = tpu.matmul %305, %10, %cst_158 {dimension_numbers = #tpu.dot_dimension_numbers<[1], [0], [0], [1], [0, 0, 1, 1], [], []>} : vector<14x4xbf16>, vector<4x128xbf16>, vector<14x128xf32> -> vector<14x128xf32>
    %307 = arith.addf %304, %306 : vector<14x128xf32>
    %308 = vector.extract_strided_slice %53 {offsets = [2, 0], sizes = [14, 4], strides = [1, 1]} : vector<16x4xbf16> to vector<14x4xbf16>
    %cst_159 = arith.constant dense<0.000000e+00> : vector<14x128xf32>
    %309 = tpu.matmul %308, %12, %cst_159 {dimension_numbers = #tpu.dot_dimension_numbers<[1], [0], [0], [1], [0, 0, 1, 1], [], []>} : vector<14x4xbf16>, vector<4x128xbf16>, vector<14x128xf32> -> vector<14x128xf32>
    %310 = arith.addf %307, %309 : vector<14x128xf32>
    %311 = vector.extract_strided_slice %57 {offsets = [0, 0], sizes = [14, 4], strides = [1, 1]} : vector<16x4xbf16> to vector<14x4xbf16>
    %cst_160 = arith.constant dense<0.000000e+00> : vector<14x128xf32>
    %312 = tpu.matmul %311, %14, %cst_160 {dimension_numbers = #tpu.dot_dimension_numbers<[1], [0], [0], [1], [0, 0, 1, 1], [], []>} : vector<14x4xbf16>, vector<4x128xbf16>, vector<14x128xf32> -> vector<14x128xf32>
    %313 = arith.addf %310, %312 : vector<14x128xf32>
    %314 = vector.extract_strided_slice %57 {offsets = [1, 0], sizes = [14, 4], strides = [1, 1]} : vector<16x4xbf16> to vector<14x4xbf16>
    %cst_161 = arith.constant dense<0.000000e+00> : vector<14x128xf32>
    %315 = tpu.matmul %314, %16, %cst_161 {dimension_numbers = #tpu.dot_dimension_numbers<[1], [0], [0], [1], [0, 0, 1, 1], [], []>} : vector<14x4xbf16>, vector<4x128xbf16>, vector<14x128xf32> -> vector<14x128xf32>
    %316 = arith.addf %313, %315 : vector<14x128xf32>
    %317 = vector.extract_strided_slice %57 {offsets = [2, 0], sizes = [14, 4], strides = [1, 1]} : vector<16x4xbf16> to vector<14x4xbf16>
    %cst_162 = arith.constant dense<0.000000e+00> : vector<14x128xf32>
    %318 = tpu.matmul %317, %18, %cst_162 {dimension_numbers = #tpu.dot_dimension_numbers<[1], [0], [0], [1], [0, 0, 1, 1], [], []>} : vector<14x4xbf16>, vector<4x128xbf16>, vector<14x128xf32> -> vector<14x128xf32>
    %319 = arith.addf %316, %318 : vector<14x128xf32>
    %320 = vector.broadcast %19 : vector<1x128xf32> to vector<14x128xf32>
    %321 = arith.addf %319, %320 : vector<14x128xf32>
    %cst_163 = arith.constant 0.000000e+00 : f32
    %322 = vector.broadcast %cst_163 : f32 to vector<14x128xf32>
    %323 = arith.maximumf %321, %322 : vector<14x128xf32>
    %324 = vector.broadcast %20 : vector<1x128xf32> to vector<14x128xf32>
    %325 = arith.mulf %323, %324 : vector<14x128xf32>
    %326 = vector.broadcast %21 : vector<1x128xf32> to vector<14x128xf32>
    %327 = arith.addf %325, %326 : vector<14x128xf32>
    %c0_164 = arith.constant 0 : index
    %c6 = arith.constant 6 : index
    %c0_165 = arith.constant 0 : index
    %c0_166 = arith.constant 0 : index
    %328 = vector.load %arg7[%c0_164, %c6, %c0_165, %c0_166] : memref<1x7x14x128xf32, #tpu.memory_space<vmem>>, vector<1x1x14x128xf32>
    %329 = vector.shape_cast %328 : vector<1x1x14x128xf32> to vector<14x128xf32>
    %330 = vector.shape_cast %327 : vector<14x128xf32> to vector<1x1x14x128xf32>
    tpu.vector_store %arg7[%c0_164, %c6, %c0_165, %c0_166], %330 {strides = array<i32>} : memref<1x7x14x128xf32, #tpu.memory_space<vmem>>, vector<1x1x14x128xf32>,
    return
  }
  func.func @transform_0(%arg0: i32, %arg1: i32) -> (i32, i32, i32, i32) {
    %c0_i32 = arith.constant 0 : i32
    %c0_i32_0 = arith.constant 0 : i32
    %c0_i32_1 = arith.constant 0 : i32
    %c0_i32_2 = arith.constant 0 : i32
    return %arg0, %c0_i32, %c0_i32_0, %c0_i32_1 : i32, i32, i32, i32
  }
  func.func @transform_1(%arg0: i32, %arg1: i32) -> (i32, i32, i32, i32) {
    %c0_i32 = arith.constant 0 : i32
    %c0_i32_0 = arith.constant 0 : i32
    %c0_i32_1 = arith.constant 0 : i32
    %c0_i32_2 = arith.constant 0 : i32
    %c0_i32_3 = arith.constant 0 : i32
    return %c0_i32, %c0_i32_0, %c0_i32_1, %c0_i32_2 : i32, i32, i32, i32
  }
  func.func @transform_2(%arg0: i32, %arg1: i32) -> (i32, i32) {
    %c0_i32 = arith.constant 0 : i32
    %c0_i32_0 = arith.constant 0 : i32
    %c0_i32_1 = arith.constant 0 : i32
    return %c0_i32, %c0_i32_0 : i32, i32
  }
  func.func @transform_3(%arg0: i32, %arg1: i32) -> (i32, i32) {
    %c0_i32 = arith.constant 0 : i32
    %c0_i32_0 = arith.constant 0 : i32
    %c0_i32_1 = arith.constant 0 : i32
    return %c0_i32, %c0_i32_0 : i32, i32
  }
  func.func @transform_4(%arg0: i32, %arg1: i32) -> (i32, i32) {
    %c0_i32 = arith.constant 0 : i32
    %c0_i32_0 = arith.constant 0 : i32
    %c0_i32_1 = arith.constant 0 : i32
    return %c0_i32, %c0_i32_0 : i32, i32
  }
  func.func @transform_5(%arg0: i32, %arg1: i32) -> (i32, i32, i32, i32) {
    %c0_i32 = arith.constant 0 : i32
    %c0_i32_0 = arith.constant 0 : i32
    %c0_i32_1 = arith.constant 0 : i32
    return %arg0, %arg1, %c0_i32, %c0_i32_0 : i32, i32, i32, i32
  }
}

</mosaic_0001>

<bundles_post_ra>
// kernel: convolution2d_forward.1
= control target key start
LH: loop header
LB: loop body
LE: loop exit
PB: predicated region body
PF: predicated region fallthrough
CT: control target
= control target key end

     0   :  { %s4204_s18 = smov 0   ;;  %s4206_s19 = smov 0   ;;  %s4813_s0 = inlined_call_operand.vmem [shape: bf16[2,16,16,4], index: 0, kind: input, shape index: {}]   ;;  %s4814_s1 = inlined_call_operand.vmem [shape: bf16[3,3,4,128], index: 1, kind: input, shape index: {}]   ;;  %s4815_s2 = inlined_call_operand.vmem [shape: f32[1,128], index: 2, kind: input, shape index: {}]   ;;  %s4816_s3 = inlined_call_operand.vmem [shape: f32[1,128], index: 3, kind: input, shape index: {}]   ;;  %s4817_s4 = inlined_call_operand.vmem [shape: f32[1,128], index: 4, kind: input, shape index: {}]   ;;  %s4818_s5 = inlined_call_operand.vmem [shape: f32[2,14,14,128], index: 5, kind: output, shape index: {}]  }
   0x1   :  { %s4208_s20 = smov 0   ;;  %s4210_s21 = smov 0  }
   0x2   :  { %s4212_s22 = smov 0  }
   0x3 LB: > { %s24_s23 = sadd.s32 1, %s4162_s20  ;;  %s27_s24 = sadd.s32 1, %s4166_s21  ;;  %s4170_s22 = sphi %s4212_s22, %s15_s22   ;;  %s4166_s21 = sphi %s4210_s21, %s4823_s21   ;;  %s4162_s20 = sphi %s4208_s20, %s4822_s20   ;;  %s4158_s19 = sphi %s4206_s19, %s4821_s19   ;;  %s4154_s18 = sphi %s4204_s18, %s4820_s18  }
   0x4   : > { %p25_p0 = scmp.ge.s32.totalorder %s24_s23, 2  ;;  %p3446_p1 = scmp.ge.s32.totalorder %s4170_s22, 1 }
   0x5   : > { %p201_p2 = scmp.lt.s32.totalorder %s4170_s22, 5 }
   0x6   : > { %s4825_s23 = smov (%p25_p0, %s24_s23), 0  ;;  %s4827_s24 = smov (!%p25_p0, %s27_s24), %s4166_s21 }
   0x7   : > { %p202_p3 = pnand %p3446_p1, %p201_p2  ;;  %p29_p4 = scmp.ge.s32.totalorder %s4827_s24, 2 }
   0x8   : > { %p234_p5 = scmp.lt.s32.totalorder (!%p202_p3), %s4158_s19, 1  ;;  %s3575_s29 = smul.u32 (!%p202_p3), 56, %s4154_s18 }
   0x9   : > { %s4829_s24 = smov (%p29_p4, %s4827_s24), 0  ;;  %205 = sbr.rel (%p202_p3) target bundleno = 482 (0x1e2), region = 40 }
   0xa   : > { %s239_s6 = smul.u32 (!%p202_p3), 7, %s4154_s18 }
   0xc   : > { %p4666_p6 = scmp.lt.s32.totalorder (!%p202_p3), %s239_s6, 13 }
   0xe   : > { %v3451_v0 = vld [vmem:[%s4814_s1 + $0x2] sm:$0x3]  ;;  %vm341_vm0 = vcmask 1041408   ;;  %v252_v1 = vld [vmem:[%s4814_s1] sm:$0x3]  ;;  %v4172_v2 = vmov 0.0  }
   0xf   : > { %3702 = vmatprep.subr.bf16.mxu0 %v4172_v2  ;;  %v4246_v3 = vsel %vm341_vm0, %v3451_v0, 0  ;;  %3708 = vmatprep.subr.bf16.mxu1 %v4172_v2  ;;  %v4250_v4 = vsel %vm341_vm0, %v252_v1, 0  ;;  %vm4173_vm1 = vmmov 0   ;;  %s4831_s19 = smov (!%p234_p5, %s4158_s19), 1  ;;  %v3453_v5 = vld [vmem:[%s4814_s1 + $0x6] sm:$0x3] }
  0x10   : > { %3703 = vmatpush3.bf16.msra.mxu0 %v4246_v3  ;;  %3709 = vmatpush3.bf16.msra.mxu1 %v4250_v4  ;;  %s3574_s30 = sshll.u32 %s4831_s19, 7  ;;  %vm337_vm2 = vcmask 31744   ;;  %v4276_v7 = vsel %vm341_vm0, %v3453_v5, 0  ;;  %v3452_v10 = vld [vmem:[%s4814_s1 + $0x4] sm:$0x3]  ;;  %s4833_s6 = smov (!%p4666_p6, %s239_s6), 13 }
  0x11   : > { %3704 = vmatprep.mubr.msk.bf16.mxu0 %vm4173_vm1, %v4172_v2  ;;  %3710 = vmatprep.mubr.msk.bf16.mxu1 %vm4173_vm1, %v4172_v2  ;;  %s238_s10 = scalar_lea.vmem %s4813_s0, %s3574_s30  ;;  %v3455_v12 = vld [vmem:[%s4814_s1 + $0xa] sm:$0x3]  ;;  %v4290_v14 = vsel %vm341_vm0, %v3452_v10, 0  ;;  %v3454_v18 = vld [vmem:[%s4814_s1 + $0x8] sm:$0x3]  ;;  %s4080_s18 = smul.u32 28, %s4831_s19 }
  0x12   : > { %3714 = vmatprep.subr.bf16.mxu0 %v4172_v2  ;;  %3720 = vmatprep.subr.bf16.mxu1 %v4172_v2  ;;  %s4272_s11 = scalar_lea.vmem %s238_s10, %s3575_s29  ;;  %v4295_v16 = vsel %vm341_vm0, %v3455_v12, 0  ;;  %v3457_v21 = vld [vmem:[%s4814_s1 + $0xe] sm:$0x3]  ;;  %v4316_v22 = vsel %vm341_vm0, %v3454_v18, 0  ;;  %v3456_v30 = vld [vmem:[%s4814_s1 + $0xc] sm:$0x3] }
  0x13   : > { %v4123_v6 = vld [vmem:[%s4272_s11] sm:$0xff]   ;;  %v4124_v15 = vld [vmem:[%s4272_s11 + $0x8] sm:$0xff]   ;;  %v4303_v17 = vld [vmem:[%s4272_s11 + $0x10] sm:$0xff]   ;;  %v4321_v27 = vsel %vm341_vm0, %v3457_v21, 0  ;;  %v4337_v32 = vsel %vm341_vm0, %v3456_v30, 0  ;;  %s3449_s8 = sshll.u32 %s4833_s6, 1 }
  0x14   : > { %v331_v8 = vshrl.u32 %v4123_v6, 16  ;;  %v333_v9 = vshll.u32 %v4123_v6, 16  ;;  %3711 = vmatmul.mubr.msk.bf16.vlgmr.msra.gmra.mxu1 %vm337_vm2, %v4123_v6  ;;  %v432_v19 = vrot.slane %v4123_v6, 1  ;;  %v538_v20 = vshll.u32 %v4124_v15, 16  ;;  %v3458_v34 = vld [vmem:[%s4814_s1 + $0x10] sm:$0x3]  ;;  %s246_s19 = sadd.s32 %s4080_s18, %s3449_s8 }
  0x15   : > { %3721 = vmatpush3.bf16.msra.mxu1 %v4276_v7  ;;  %3722 = vmatprep.mubr.msk.bf16.mxu1 %vm4173_vm1, %v4172_v2  ;;  %v591_v23 = vrot.slane %v4124_v15, 1  ;;  %v697_v24 = vshll.u32 %v4303_v17, 16  ;;  %v536_v25 = vshrl.u32 %v4124_v15, 16  ;;  %v695_v28 = vshrl.u32 %v4303_v17, 16  ;;  %v4392_v37 = vld [vmem:[%s4272_s11 + $0x18] sm:$0xff]   ;;  %v4439_v43 = vld [vmem:[%s4272_s11 + $0x20] sm:$0xff]  }
  0x16   : > { %v335_v11 = vrot.slane %v333_v9, 1  ;;  %3732 = vmatprep.subr.bf16.mxu1 %v4172_v2  ;;  %v540_v26 = vrot.slane %v538_v20, 1  ;;  %v4356_v35 = vsel %vm341_vm0, %v3458_v34, 0  ;;  %v750_v36 = vrot.slane %v4303_v17, 1  ;;  %v4505_v49 = vld [vmem:[%s4272_s11 + $0x28] sm:$0xff]   ;;  %v4552_v55 = vld [vmem:[%s4272_s11 + $0x30] sm:$0xff]  }
  0x17   : > { %v699_v29 = vrot.slane %v697_v24, 1  ;;  %v1135_v38 = vshll.u32 %v4392_v37, 16  ;;  %v1185_v39 = vrot.slane %v4392_v37, 1  ;;  %v1133_v40 = vshrl.u32 %v4392_v37, 16  ;;  %v4621_v0 = vld [vmem:[%s4272_s11 + $0x38] sm:$0xff]   ;;  %s3450_s13 = sshll.u32 %s246_s19, 3 }
  0x18   : > { %v336_v13 = vor.u32 %v335_v11, %v331_v8  ;;  %v541_v31 = vor.u32 %v540_v26, %v536_v25  ;;  %v1550_v44 = vshll.u32 %v4439_v43, 16  ;;  %v1548_v45 = vshrl.u32 %v4439_v43, 16  ;;  %s4727_s25 = scalar_lea.vmem %s4818_s5, %s3450_s13 }
  0x19   : > { %v4339_v33 = vor.u32 %v699_v29, %v695_v28  ;;  %v1137_v41 = vrot.slane %v1135_v38, 1  ;;  %v1600_v48 = vrot.slane %v4439_v43, 1  ;;  %v1965_v50 = vshll.u32 %v4505_v49, 16 }
  0x1a   : > { %3705 = vmatmul.mubr.msk.bf16.vlgmr.msra.gmra.mxu0 %vm337_vm2, %v336_v13  ;;  %v1552_v46 = vrot.slane %v1550_v44, 1  ;;  %v2015_v51 = vrot.slane %v4505_v49, 1  ;;  %v1963_v52 = vshrl.u32 %v4505_v49, 16  ;;  %v2380_v56 = vshll.u32 %v4552_v55, 16 }
  0x1b   : > { %3715 = vmatpush3.bf16.msra.mxu0 %v4290_v14  ;;  %3716 = vmatprep.mubr.msk.bf16.mxu0 %vm4173_vm1, %v4172_v2  ;;  %v1138_v42 = vor.u32 %v1137_v41, %v1133_v40  ;;  %v1967_v53 = vrot.slane %v1965_v50, 1  ;;  %v2378_v57 = vshrl.u32 %v4552_v55, 16  ;;  %v4594_v60 = vrot.slane %v4552_v55, 1  ;;  %v4681_v50 = vld [vmem:[%s4272_s11 + $0x40] sm:$0xff]  }
  0x1c   : > { %3726 = vmatprep.subr.bf16.mxu0 %v4172_v2  ;;  %3723 = vmatmul.mubr.msk.bf16.vlgmr.msra.gmra.mxu1 %vm337_vm2, %v4124_v15  ;;  %v4457_v47 = vor.u32 %v1552_v46, %v1548_v45  ;;  %v2382_v58 = vrot.slane %v2380_v56, 1  ;;  %v2795_v11 = vshll.u32 %v4621_v0, 16  ;;  %v3210_v56 = vshll.u32 %v4681_v50, 16 }
  0x1d   : > { %3733 = vmatpush3.bf16.msra.mxu1 %v4295_v16  ;;  %3734 = vmatprep.mubr.msk.bf16.mxu1 %vm4173_vm1, %v4172_v2  ;;  %v1968_v54 = vor.u32 %v1967_v53, %v1963_v52 }
  0x1e   : > { %3744 = vmatprep.subr.bf16.mxu1 %v4172_v2  ;;  %v4570_v59 = vor.u32 %v2382_v58, %v2378_v57  ;;  %v2797_v20 = vrot.slane %v2795_v11, 1 }
  0x22   : > { %3717 = vmatmul.mubr.msk.bf16.vlgmr.msra.gmra.mxu0 %vm337_vm2, %v432_v19  ;;  %v2793_v19 = vshrl.u32 %v4621_v0, 16 }
  0x23   : > { %3727 = vmatpush3.bf16.msra.mxu0 %v4316_v22  ;;  %3728 = vmatprep.mubr.msk.bf16.mxu0 %vm4173_vm1, %v4172_v2 }
  0x24   : > { %3738 = vmatprep.subr.bf16.mxu0 %v4172_v2  ;;  %3735 = vmatmul.mubr.msk.bf16.vlgmr.msra.gmra.mxu1 %vm337_vm2, %v591_v23  ;;  %v4650_v25 = vor.u32 %v2797_v20, %v2793_v19 }
  0x25   : > { %3745 = vmatpush3.bf16.msra.mxu1 %v4321_v27  ;;  %3746 = vmatprep.mubr.msk.bf16.mxu1 %vm4173_vm1, %v4172_v2 }
  0x26   : > { %3756 = vmatprep.subr.bf16.mxu1 %v4172_v2 }
  0x2a   : > { %3729 = vmatmul.mubr.msk.bf16.vlgmr.msra.gmra.mxu0 %vm337_vm2, %v541_v31 }
  0x2b   : > { %3739 = vmatpush3.bf16.msra.mxu0 %v4337_v32  ;;  %3740 = vmatprep.mubr.msk.bf16.mxu0 %vm4173_vm1, %v4172_v2 }
  0x2c   : > { %3750 = vmatprep.subr.bf16.mxu0 %v4172_v2  ;;  %3747 = vmatmul.mubr.msk.bf16.vlgmr.msra.gmra.mxu1 %vm337_vm2, %v4339_v33 }
  0x2d   : > { %3757 = vmatpush3.bf16.msra.mxu1 %v4246_v3  ;;  %3758 = vmatprep.mubr.msk.bf16.mxu1 %vm4173_vm1, %v4172_v2 }
  0x2e   : > { %3768 = vmatprep.subr.bf16.mxu1 %v4172_v2 }
  0x32   : > { %3741 = vmatmul.mubr.msk.bf16.vlgmr.msra.gmra.mxu0 %vm337_vm2, %v4303_v17 }
  0x33   : > { %3751 = vmatpush3.bf16.msra.mxu0 %v4356_v35  ;;  %3752 = vmatprep.mubr.msk.bf16.mxu0 %vm4173_vm1, %v4172_v2 }
  0x34   : > { %3762 = vmatprep.subr.bf16.mxu0 %v4172_v2  ;;  %3759 = vmatmul.mubr.msk.bf16.vlgmr.msra.gmra.mxu1 %vm337_vm2, %v541_v31 }
  0x35   : > { %3769 = vmatpush3.bf16.msra.mxu1 %v4290_v14  ;;  %3770 = vmatprep.mubr.msk.bf16.mxu1 %vm4173_vm1, %v4172_v2 }
  0x36   : > { %3780 = vmatprep.subr.bf16.mxu1 %v4172_v2 }
  0x3a   : > { %3753 = vmatmul.mubr.msk.bf16.vlgmr.msra.gmra.mxu0 %vm337_vm2, %v750_v36 }
  0x3b   : > { %3763 = vmatpush3.bf16.msra.mxu0 %v4250_v4  ;;  %3764 = vmatprep.mubr.msk.bf16.mxu0 %vm4173_vm1, %v4172_v2 }
  0x3c   : > { %3774 = vmatprep.subr.bf16.mxu0 %v4172_v2  ;;  %3771 = vmatmul.mubr.msk.bf16.vlgmr.msra.gmra.mxu1 %vm337_vm2, %v591_v23 }
  0x3d   : > { %3781 = vmatpush3.bf16.msra.mxu1 %v4316_v22  ;;  %3782 = vmatprep.mubr.msk.bf16.mxu1 %vm4173_vm1, %v4172_v2 }
  0x3e   : > { %3792 = vmatprep.subr.bf16.mxu1 %v4172_v2 }
  0x42   : > { %3765 = vmatmul.mubr.msk.bf16.vlgmr.msra.gmra.mxu0 %vm337_vm2, %v4124_v15  ;;  %v2845_v15 = vrot.slane %v4621_v0, 1 }
  0x43   : > { %3775 = vmatpush3.bf16.msra.mxu0 %v4276_v7  ;;  %3776 = vmatprep.mubr.msk.bf16.mxu0 %vm4173_vm1, %v4172_v2 }
  0x44   : > { %3786 = vmatprep.subr.bf16.mxu0 %v4172_v2  ;;  %3783 = vmatmul.mubr.msk.bf16.vlgmr.msra.gmra.mxu1 %vm337_vm2, %v4339_v33 }
  0x45   : > { %3793 = vmatpush3.bf16.msra.mxu1 %v4337_v32  ;;  %3794 = vmatprep.mubr.msk.bf16.mxu1 %vm4173_vm1, %v4172_v2 }
  0x46   : > { %3804 = vmatprep.subr.bf16.mxu1 %v4172_v2 }
  0x4a   : > { %3777 = vmatmul.mubr.msk.bf16.vlgmr.msra.gmra.mxu0 %vm337_vm2, %v4303_v17 }
  0x4b   : > { %3787 = vmatpush3.bf16.msra.mxu0 %v4295_v16  ;;  %3788 = vmatprep.mubr.msk.bf16.mxu0 %vm4173_vm1, %v4172_v2 }
  0x4c   : > { %3798 = vmatprep.subr.bf16.mxu0 %v4172_v2  ;;  %3795 = vmatmul.mubr.msk.bf16.vlgmr.msra.gmra.mxu1 %vm337_vm2, %v4392_v37 }
  0x4d   : > { %3805 = vmatpush3.bf16.msra.mxu1 %v4356_v35  ;;  %3806 = vmatprep.mubr.msk.bf16.mxu1 %vm4173_vm1, %v4172_v2 }
  0x4e   : > { %3816 = vmatprep.subr.bf16.mxu1 %v4172_v2 }
  0x52   : > { %3789 = vmatmul.mubr.msk.bf16.vlgmr.msra.gmra.mxu0 %vm337_vm2, %v750_v36 }
  0x53   : > { %3799 = vmatpush3.bf16.msra.mxu0 %v4321_v27  ;;  %3800 = vmatprep.mubr.msk.bf16.mxu0 %vm4173_vm1, %v4172_v2 }
  0x54   : > { %3810 = vmatprep.subr.bf16.mxu0 %v4172_v2  ;;  %3807 = vmatmul.mubr.msk.bf16.vlgmr.msra.gmra.mxu1 %vm337_vm2, %v1185_v39 }
  0x55   : > { %3817 = vmatpush3.bf16.msra.mxu1 %v4250_v4  ;;  %3818 = vmatprep.mubr.msk.bf16.mxu1 %vm4173_vm1, %v4172_v2 }
  0x56   : > { %3828 = vmatprep.subr.bf16.mxu1 %v4172_v2 }
  0x5a   : > { %3801 = vmatmul.mubr.msk.bf16.vlgmr.msra.gmra.mxu0 %vm337_vm2, %v1138_v42 }
  0x5b   : > { %3811 = vmatpush3.bf16.msra.mxu0 %v4246_v3  ;;  %3812 = vmatprep.mubr.msk.bf16.mxu0 %vm4173_vm1, %v4172_v2 }
  0x5c   : > { %3822 = vmatprep.subr.bf16.mxu0 %v4172_v2  ;;  %3819 = vmatmul.mubr.msk.bf16.vlgmr.msra.gmra.mxu1 %vm337_vm2, %v4303_v17 }
  0x5d   : > { %3829 = vmatpush3.bf16.msra.mxu1 %v4276_v7  ;;  %3830 = vmatprep.mubr.msk.bf16.mxu1 %vm4173_vm1, %v4172_v2 }
  0x5e   : > { %3840 = vmatprep.subr.bf16.mxu1 %v4172_v2 }
  0x62   : > { %3813 = vmatmul.mubr.msk.bf16.vlgmr.msra.gmra.mxu0 %vm337_vm2, %v4339_v33 }
  0x63   : > { %3823 = vmatpush3.bf16.msra.mxu0 %v4290_v14  ;;  %3824 = vmatprep.mubr.msk.bf16.mxu0 %vm4173_vm1, %v4172_v2 }
  0x64   : > { %3834 = vmatprep.subr.bf16.mxu0 %v4172_v2  ;;  %3831 = vmatmul.mubr.msk.bf16.vlgmr.msra.gmra.mxu1 %vm337_vm2, %v4392_v37 }
  0x65   : > { %3841 = vmatpush3.bf16.msra.mxu1 %v4295_v16  ;;  %3842 = vmatprep.mubr.msk.bf16.mxu1 %vm4173_vm1, %v4172_v2 }
  0x66   : > { %3852 = vmatprep.subr.bf16.mxu1 %v4172_v2 }
  0x6a   : > { %3825 = vmatmul.mubr.msk.bf16.vlgmr.msra.gmra.mxu0 %vm337_vm2, %v750_v36 }
  0x6b   : > { %3835 = vmatpush3.bf16.msra.mxu0 %v4316_v22  ;;  %3836 = vmatprep.mubr.msk.bf16.mxu0 %vm4173_vm1, %v4172_v2 }
  0x6c   : > { %3846 = vmatprep.subr.bf16.mxu0 %v4172_v2  ;;  %3843 = vmatmul.mubr.msk.bf16.vlgmr.msra.gmra.mxu1 %vm337_vm2, %v1185_v39 }
  0x6d   : > { %3853 = vmatpush3.bf16.msra.mxu1 %v4321_v27  ;;  %3854 = vmatprep.mubr.msk.bf16.mxu1 %vm4173_vm1, %v4172_v2 }
  0x6e   : > { %3864 = vmatprep.subr.bf16.mxu1 %v4172_v2 }
  0x72   : > { %3837 = vmatmul.mubr.msk.bf16.vlgmr.msra.gmra.mxu0 %vm337_vm2, %v1138_v42 }
  0x73   : > { %3847 = vmatpush3.bf16.msra.mxu0 %v4337_v32  ;;  %3848 = vmatprep.mubr.msk.bf16.mxu0 %vm4173_vm1, %v4172_v2 }
  0x74   : > { %3858 = vmatprep.subr.bf16.mxu0 %v4172_v2  ;;  %3855 = vmatmul.mubr.msk.bf16.vlgmr.msra.gmra.mxu1 %vm337_vm2, %v4457_v47 }
  0x75   : > { %3865 = vmatpush3.bf16.msra.mxu1 %v4246_v3  ;;  %3866 = vmatprep.mubr.msk.bf16.mxu1 %vm4173_vm1, %v4172_v2 }
  0x76   : > { %3876 = vmatprep.subr.bf16.mxu1 %v4172_v2 }
  0x7a   : > { %3849 = vmatmul.mubr.msk.bf16.vlgmr.msra.gmra.mxu0 %vm337_vm2, %v4439_v43 }
  0x7b   : > { %3859 = vmatpush3.bf16.msra.mxu0 %v4356_v35  ;;  %3860 = vmatprep.mubr.msk.bf16.mxu0 %vm4173_vm1, %v4172_v2 }
  0x7c   : > { %3870 = vmatprep.subr.bf16.mxu0 %v4172_v2  ;;  %3867 = vmatmul.mubr.msk.bf16.vlgmr.msra.gmra.mxu1 %vm337_vm2, %v1138_v42 }
  0x7d   : > { %3877 = vmatpush3.bf16.msra.mxu1 %v4290_v14  ;;  %3878 = vmatprep.mubr.msk.bf16.mxu1 %vm4173_vm1, %v4172_v2 }
  0x7e   : > { %3888 = vmatprep.subr.bf16.mxu1 %v4172_v2 }
  0x82   : > { %3861 = vmatmul.mubr.msk.bf16.vlgmr.msra.gmra.mxu0 %vm337_vm2, %v1600_v48 }
  0x83   : > { %3871 = vmatpush3.bf16.msra.mxu0 %v4250_v4  ;;  %3872 = vmatprep.mubr.msk.bf16.mxu0 %vm4173_vm1, %v4172_v2 }
  0x84   : > { %3882 = vmatprep.subr.bf16.mxu0 %v4172_v2  ;;  %3879 = vmatmul.mubr.msk.bf16.vlgmr.msra.gmra.mxu1 %vm337_vm2, %v1185_v39 }
  0x85   : > { %3889 = vmatpush3.bf16.msra.mxu1 %v4316_v22  ;;  %3890 = vmatprep.mubr.msk.bf16.mxu1 %vm4173_vm1, %v4172_v2 }
  0x86   : > { %3900 = vmatprep.subr.bf16.mxu1 %v4172_v2 }
  0x8a   : > { %3873 = vmatmul.mubr.msk.bf16.vlgmr.msra.gmra.mxu0 %vm337_vm2, %v4392_v37 }
  0x8b   : > { %3883 = vmatpush3.bf16.msra.mxu0 %v4276_v7  ;;  %3884 = vmatprep.mubr.msk.bf16.mxu0 %vm4173_vm1, %v4172_v2 }
  0x8c   : > { %3894 = vmatprep.subr.bf16.mxu0 %v4172_v2  ;;  %3891 = vmatmul.mubr.msk.bf16.vlgmr.msra.gmra.mxu1 %vm337_vm2, %v4457_v47 }
  0x8d   : > { %3901 = vmatpush3.bf16.msra.mxu1 %v4337_v32  ;;  %3902 = vmatprep.mubr.msk.bf16.mxu1 %vm4173_vm1, %v4172_v2 }
  0x8e   : > { %3912 = vmatprep.subr.bf16.mxu1 %v4172_v2 }
  0x92   : > { %3885 = vmatmul.mubr.msk.bf16.vlgmr.msra.gmra.mxu0 %vm337_vm2, %v4439_v43 }
  0x93   : > { %3895 = vmatpush3.bf16.msra.mxu0 %v4295_v16  ;;  %3896 = vmatprep.mubr.msk.bf16.mxu0 %vm4173_vm1, %v4172_v2 }
  0x94   : > { %3906 = vmatprep.subr.bf16.mxu0 %v4172_v2  ;;  %3903 = vmatmul.mubr.msk.bf16.vlgmr.msra.gmra.mxu1 %vm337_vm2, %v4505_v49 }
  0x95   : > { %3913 = vmatpush3.bf16.msra.mxu1 %v4356_v35  ;;  %3914 = vmatprep.mubr.msk.bf16.mxu1 %vm4173_vm1, %v4172_v2 }
  0x96   : > { %3924 = vmatprep.subr.bf16.mxu1 %v4172_v2 }
  0x9a   : > { %3897 = vmatmul.mubr.msk.bf16.vlgmr.msra.gmra.mxu0 %vm337_vm2, %v1600_v48 }
  0x9b   : > { %3907 = vmatpush3.bf16.msra.mxu0 %v4321_v27  ;;  %3908 = vmatprep.mubr.msk.bf16.mxu0 %vm4173_vm1, %v4172_v2 }
  0x9c   : > { %3918 = vmatprep.subr.bf16.mxu0 %v4172_v2  ;;  %3915 = vmatmul.mubr.msk.bf16.vlgmr.msra.gmra.mxu1 %vm337_vm2, %v2015_v51 }
  0x9d   : > { %3925 = vmatpush3.bf16.msra.mxu1 %v4250_v4  ;;  %3926 = vmatprep.mubr.msk.bf16.mxu1 %vm4173_vm1, %v4172_v2 }
  0x9e   : > { %3936 = vmatprep.subr.bf16.mxu1 %v4172_v2 }
  0xa2   : > { %3909 = vmatmul.mubr.msk.bf16.vlgmr.msra.gmra.mxu0 %vm337_vm2, %v1968_v54 }
  0xa3   : > { %3919 = vmatpush3.bf16.msra.mxu0 %v4246_v3  ;;  %3920 = vmatprep.mubr.msk.bf16.mxu0 %vm4173_vm1, %v4172_v2 }
  0xa4   : > { %3930 = vmatprep.subr.bf16.mxu0 %v4172_v2  ;;  %3927 = vmatmul.mubr.msk.bf16.vlgmr.msra.gmra.mxu1 %vm337_vm2, %v4439_v43 }
  0xa5   : > { %3937 = vmatpush3.bf16.msra.mxu1 %v4276_v7  ;;  %3938 = vmatprep.mubr.msk.bf16.mxu1 %vm4173_vm1, %v4172_v2 }
  0xa6   : > { %3948 = vmatprep.subr.bf16.mxu1 %v4172_v2 }
  0xaa   : > { %3921 = vmatmul.mubr.msk.bf16.vlgmr.msra.gmra.mxu0 %vm337_vm2, %v4457_v47 }
  0xab   : > { %3931 = vmatpush3.bf16.msra.mxu0 %v4290_v14  ;;  %3932 = vmatprep.mubr.msk.bf16.mxu0 %vm4173_vm1, %v4172_v2 }
  0xac   : > { %3942 = vmatprep.subr.bf16.mxu0 %v4172_v2  ;;  %3939 = vmatmul.mubr.msk.bf16.vlgmr.msra.gmra.mxu1 %vm337_vm2, %v4505_v49 }
  0xad   : > { %3949 = vmatpush3.bf16.msra.mxu1 %v4295_v16  ;;  %3950 = vmatprep.mubr.msk.bf16.mxu1 %vm4173_vm1, %v4172_v2 }
  0xae   : > { %3960 = vmatprep.subr.bf16.mxu1 %v4172_v2 }
  0xb2   : > { %3933 = vmatmul.mubr.msk.bf16.vlgmr.msra.gmra.mxu0 %vm337_vm2, %v1600_v48 }
  0xb3   : > { %3943 = vmatpush3.bf16.msra.mxu0 %v4316_v22  ;;  %3944 = vmatprep.mubr.msk.bf16.mxu0 %vm4173_vm1, %v4172_v2 }
  0xb4   : > { %3954 = vmatprep.subr.bf16.mxu0 %v4172_v2  ;;  %3951 = vmatmul.mubr.msk.bf16.vlgmr.msra.gmra.mxu1 %vm337_vm2, %v2015_v51 }
  0xb5   : > { %3961 = vmatpush3.bf16.msra.mxu1 %v4321_v27  ;;  %3962 = vmatprep.mubr.msk.bf16.mxu1 %vm4173_vm1, %v4172_v2 }
  0xb6   : > { %3972 = vmatprep.subr.bf16.mxu1 %v4172_v2 }
  0xba   : > { %3945 = vmatmul.mubr.msk.bf16.vlgmr.msra.gmra.mxu0 %vm337_vm2, %v1968_v54 }
  0xbb   : > { %3955 = vmatpush3.bf16.msra.mxu0 %v4337_v32  ;;  %3956 = vmatprep.mubr.msk.bf16.mxu0 %vm4173_vm1, %v4172_v2 }
  0xbc   : > { %3966 = vmatprep.subr.bf16.mxu0 %v4172_v2  ;;  %3963 = vmatmul.mubr.msk.bf16.vlgmr.msra.gmra.mxu1 %vm337_vm2, %v4570_v59 }
  0xbd   : > { %3973 = vmatpush3.bf16.msra.mxu1 %v4246_v3  ;;  %3974 = vmatprep.mubr.msk.bf16.mxu1 %vm4173_vm1, %v4172_v2 }
  0xbe   : > { %3984 = vmatprep.subr.bf16.mxu1 %v4172_v2 }
  0xc2   : > { %3957 = vmatmul.mubr.msk.bf16.vlgmr.msra.gmra.mxu0 %vm337_vm2, %v4552_v55 }
  0xc3   : > { %3967 = vmatpush3.bf16.msra.mxu0 %v4356_v35  ;;  %3968 = vmatprep.mubr.msk.bf16.mxu0 %vm4173_vm1, %v4172_v2 }
  0xc4   : > { %3978 = vmatprep.subr.bf16.mxu0 %v4172_v2  ;;  %3975 = vmatmul.mubr.msk.bf16.vlgmr.msra.gmra.mxu1 %vm337_vm2, %v1968_v54 }
  0xc5   : > { %3985 = vmatpush3.bf16.msra.mxu1 %v4290_v14  ;;  %3986 = vmatprep.mubr.msk.bf16.mxu1 %vm4173_vm1, %v4172_v2 }
  0xc6   : > { %3996 = vmatprep.subr.bf16.mxu1 %v4172_v2 }
  0xca   : > { %3969 = vmatmul.mubr.msk.bf16.vlgmr.msra.gmra.mxu0 %vm337_vm2, %v4594_v60 }
  0xcb   : > { %3979 = vmatpush3.bf16.msra.mxu0 %v4250_v4  ;;  %3980 = vmatprep.mubr.msk.bf16.mxu0 %vm4173_vm1, %v4172_v2 }
  0xcc   : > { %3990 = vmatprep.subr.bf16.mxu0 %v4172_v2  ;;  %3987 = vmatmul.mubr.msk.bf16.vlgmr.msra.gmra.mxu1 %vm337_vm2, %v2015_v51 }
  0xcd   : > { %3997 = vmatpush3.bf16.msra.mxu1 %v4316_v22  ;;  %3998 = vmatprep.mubr.msk.bf16.mxu1 %vm4173_vm1, %v4172_v2 }
  0xce   : > { %4008 = vmatprep.subr.bf16.mxu1 %v4172_v2 }
  0xd2   : > { %3981 = vmatmul.mubr.msk.bf16.vlgmr.msra.gmra.mxu0 %vm337_vm2, %v4505_v49 }
  0xd3   : > { %3991 = vmatpush3.bf16.msra.mxu0 %v4276_v7  ;;  %3992 = vmatprep.mubr.msk.bf16.mxu0 %vm4173_vm1, %v4172_v2 }
  0xd4   : > { %4002 = vmatprep.subr.bf16.mxu0 %v4172_v2  ;;  %v425_v61 = vpop.f32.mrf.mxu1  ;;  %3999 = vmatmul.mubr.msk.bf16.vlgmr.msra.gmra.mxu1 %vm337_vm2, %v4570_v59 }
  0xd5   : > { %4009 = vmatpush3.bf16.msra.mxu1 %v4337_v32  ;;  %4010 = vmatprep.mubr.msk.bf16.mxu1 %vm4173_vm1, %v4172_v2 }
  0xd6   : > { %v3712_v62 = vpop.f32.mrf.mxu1  ;;  %4020 = vmatprep.subr.bf16.mxu1 %v4172_v2 }
  0xd8   : > { %v428_v63 = vpop.f32.mrf.mxu1 }
  0xda   : > { %v379_v1 = vpop.f32.mrf.mxu0  ;;  %3993 = vmatmul.mubr.msk.bf16.vlgmr.msra.gmra.mxu0 %vm337_vm2, %v4552_v55  ;;  %v3713_v5 = vpop.f32.mrf.mxu1 }
  0xdb   : > { %4003 = vmatpush3.bf16.msra.mxu0 %v4295_v16  ;;  %4004 = vmatprep.mubr.msk.bf16.mxu0 %vm4173_vm1, %v4172_v2  ;;  %v426_v28 = vadd.f32 %v425_v61, %v379_v1  ;;  %v3208_v5 = vshrl.u32 %v4681_v50, 16 }
  0xdc   : > { %v3706_v6 = vpop.f32.mrf.mxu0  ;;  %4014 = vmatprep.subr.bf16.mxu0 %v4172_v2  ;;  %v527_v8 = vpop.f32.mrf.mxu1  ;;  %4011 = vmatmul.mubr.msk.bf16.vlgmr.msra.gmra.mxu1 %vm337_vm2, %v4621_v0 }
  0xdd   : > { %4021 = vmatpush3.bf16.msra.mxu1 %v4356_v35  ;;  %4022 = vmatprep.mubr.msk.bf16.mxu1 %vm4173_vm1, %v4172_v2  ;;  %v3212_v6 = vrot.slane %v3210_v56, 1 }
  0xde   : > { %v382_v9 = vpop.f32.mrf.mxu0  ;;  %v3724_v10 = vpop.f32.mrf.mxu1  ;;  %4032 = vmatprep.subr.bf16.mxu1 %v4172_v2 }
  0xe0   : > { %v3707_v12 = vpop.f32.mrf.mxu0  ;;  %v530_v13 = vpop.f32.mrf.mxu1 }
  0xe1   : > { %v4720_v12 = vld [vmem:[%s4817_s4] ss:$0 sm:$0xff] }
  0xe2   : > { %v473_v17 = vpop.f32.mrf.mxu0  ;;  %4005 = vmatmul.mubr.msk.bf16.vlgmr.msra.gmra.mxu0 %vm337_vm2, %v4594_v60  ;;  %v3725_v18 = vpop.f32.mrf.mxu1 }
  0xe3   : > { %4015 = vmatpush3.bf16.msra.mxu0 %v4321_v27  ;;  %4016 = vmatprep.mubr.msk.bf16.mxu0 %vm4173_vm1, %v4172_v2  ;;  %v480_v31 = vadd.f32 %v473_v17, %v426_v28 }
  0xe4   : > { %v3718_v21 = vpop.f32.mrf.mxu0  ;;  %4026 = vmatprep.subr.bf16.mxu0 %v4172_v2  ;;  %v632_v23 = vpop.f32.mrf.mxu1  ;;  %4023 = vmatmul.mubr.msk.bf16.vlgmr.msra.gmra.mxu1 %vm337_vm2, %v2845_v15 }
  0xe5   : > { %4033 = vmatpush3.bf16.msra.mxu1 %v4250_v4  ;;  %4034 = vmatprep.mubr.msk.bf16.mxu1 %vm4173_vm1, %v4172_v2  ;;  %v429_v4 = vadd.f32 %v428_v63, %v382_v9  ;;  %v534_v38 = vadd.f32 %v527_v8, %v480_v31 }
  0xe6   : > { %v476_v24 = vpop.f32.mrf.mxu0  ;;  %v3736_v26 = vpop.f32.mrf.mxu1  ;;  %4044 = vmatprep.subr.bf16.mxu1 %v4172_v2 }
  0xe7   : > { %v481_v39 = vadd.f32 %v476_v24, %v429_v4 }
  0xe8   : > { %v3719_v29 = vpop.f32.mrf.mxu0  ;;  %v635_v30 = vpop.f32.mrf.mxu1 }
  0xe9   : > { %v535_v44 = vadd.f32 %v530_v13, %v481_v39 }
  0xea   : > { %v582_v33 = vpop.f32.mrf.mxu0  ;;  %4017 = vmatmul.mubr.msk.bf16.vlgmr.msra.gmra.mxu0 %vm337_vm2, %v4650_v25  ;;  %v3737_v34 = vpop.f32.mrf.mxu1 }
  0xeb   : > { %4027 = vmatpush3.bf16.msra.mxu0 %v4246_v3  ;;  %4028 = vmatprep.mubr.msk.bf16.mxu0 %vm4173_vm1, %v4172_v2  ;;  %v589_v41 = vadd.f32 %v582_v33, %v534_v38 }
  0xec   : > { %v3730_v36 = vpop.f32.mrf.mxu0  ;;  %4038 = vmatprep.subr.bf16.mxu0 %v4172_v2  ;;  %v741_v37 = vpop.f32.mrf.mxu1  ;;  %4035 = vmatmul.mubr.msk.bf16.vlgmr.msra.gmra.mxu1 %vm337_vm2, %v4552_v55 }
  0xed   : > { %4045 = vmatpush3.bf16.msra.mxu1 %v4276_v7  ;;  %4046 = vmatprep.mubr.msk.bf16.mxu1 %vm4173_vm1, %v4172_v2  ;;  %v639_v46 = vadd.f32 %v632_v23, %v589_v41 }
  0xee   : > { %v585_v40 = vpop.f32.mrf.mxu0  ;;  %v3748_v3 = vpop.f32.mrf.mxu1  ;;  %4056 = vmatprep.subr.bf16.mxu1 %v4172_v2 }
  0xef   : > { %v590_v47 = vadd.f32 %v585_v40, %v535_v44  ;;  %v3260_v3 = vrot.slane %v4681_v50, 1 }
  0xf0   : > { %v3731_v42 = vpop.f32.mrf.mxu0  ;;  %v744_v43 = vpop.f32.mrf.mxu1 }
  0xf1   : > { %v640_v53 = vadd.f32 %v635_v30, %v590_v47 }
  0xf2   : > { %v686_v45 = vpop.f32.mrf.mxu0  ;;  %4029 = vmatmul.mubr.msk.bf16.vlgmr.msra.gmra.mxu0 %vm337_vm2, %v4570_v59  ;;  %v3749_v7 = vpop.f32.mrf.mxu1 }
  0xf3   : > { %4039 = vmatpush3.bf16.msra.mxu0 %v4290_v14  ;;  %4040 = vmatprep.mubr.msk.bf16.mxu0 %vm4173_vm1, %v4172_v2  ;;  %v693_v51 = vadd.f32 %v686_v45, %v639_v46 }
  0xf4   : > { %v3742_v48 = vpop.f32.mrf.mxu0  ;;  %4050 = vmatprep.subr.bf16.mxu0 %v4172_v2  ;;  %v4676_v49 = vpop.f32.mrf.mxu1  ;;  %4047 = vmatmul.mubr.msk.bf16.vlgmr.msra.gmra.mxu1 %vm337_vm2, %v4621_v0 }
  0xf5   : > { %4057 = vmatpush3.bf16.msra.mxu1 %v4295_v16  ;;  %4058 = vmatprep.mubr.msk.bf16.mxu1 %vm4173_vm1, %v4172_v2  ;;  %v748_v57 = vadd.f32 %v741_v37, %v693_v51  ;;  %v4696_v16 = vld [vmem:[%s4815_s2] ss:$0 sm:$0xff] }
  0xf6   : > { %v689_v14 = vpop.f32.mrf.mxu0  ;;  %v3760_v52 = vpop.f32.mrf.mxu1  ;;  %4068 = vmatprep.subr.bf16.mxu1 %v4172_v2 }
  0xf7   : > { %v694_v58 = vadd.f32 %v689_v14, %v640_v53 }
  0xf8   : > { %v3743_v54 = vpop.f32.mrf.mxu0  ;;  %v4690_v55 = vpop.f32.mrf.mxu1 }
  0xfa   : > { %v791_v59 = vpop.f32.mrf.mxu0  ;;  %4041 = vmatmul.mubr.msk.bf16.vlgmr.msra.gmra.mxu0 %vm337_vm2, %v4594_v60  ;;  %v3761_v61 = vpop.f32.mrf.mxu1  ;;  %v749_v60 = vadd.f32 %v744_v43, %v694_v58 }
  0xfb   : > { %v798_v62 = vadd.f32 %v791_v59, %v748_v57  ;;  %4051 = vmatpush3.bf16.msra.mxu0 %v4316_v22  ;;  %4052 = vmatprep.mubr.msk.bf16.mxu0 %vm4173_vm1, %v4172_v2  ;;  %v4715_v22 = vld [vmem:[%s4816_s3] ss:$0 sm:$0xff] }
  0xfc   : > { %v3754_v63 = vpop.f32.mrf.mxu0  ;;  %4062 = vmatprep.subr.bf16.mxu0 %v4172_v2  ;;  %v944_v1 = vpop.f32.mrf.mxu1  ;;  %4059 = vmatmul.mubr.msk.bf16.vlgmr.msra.gmra.mxu1 %vm337_vm2, %v2845_v15  ;;  %v3213_v15 = vor.u32 %v3212_v6, %v3208_v5 }
  0xfd   : > { %v806_v8 = vadd.f32 %v4696_v16, %v798_v62  ;;  %4069 = vmatpush3.bf16.msra.mxu1 %v4321_v27  ;;  %4070 = vmatprep.mubr.msk.bf16.mxu1 %vm4173_vm1, %v4172_v2 }
  0xfe   : > { %v794_v9 = vpop.f32.mrf.mxu0  ;;  %v3772_v0 = vpop.f32.mrf.mxu1 }
  0xff   : > { %v808_v10 = vmax.f32 %v806_v8, 0.0  ;;  %v799_v11 = vadd.f32 %v794_v9, %v749_v60 }
 0x100   : > { %v3755_v13 = vpop.f32.mrf.mxu0  ;;  %v947_v27 = vpop.f32.mrf.mxu1 }
 0x101   : > { %v816_v17 = vmul.f32 %v4715_v22, %v808_v10  ;;  %v807_v18 = vadd.f32 %v4696_v16, %v799_v11 }
 0x102   : > { %v903_v19 = vpop.f32.mrf.mxu0  ;;  %4053 = vmatmul.mubr.msk.bf16.vlgmr.msra.gmra.mxu0 %vm337_vm2, %v4650_v25  ;;  %v3773_v20 = vpop.f32.mrf.mxu1 }
 0x103   : > { %v824_v21 = vadd.f32 %v4720_v12, %v816_v17  ;;  %v809_v23 = vmax.f32 %v807_v18, 0.0  ;;  %4063 = vmatpush3.bf16.msra.mxu0 %v4337_v32  ;;  %4064 = vmatprep.mubr.msk.bf16.mxu0 %vm4173_vm1, %v4172_v2  ;;  %v904_v32 = vadd.f32 %v903_v19, %v4676_v49 }
 0x104   : > { %v3766_v24 = vpop.f32.mrf.mxu0  ;;  %4074 = vmatprep.subr.bf16.mxu0 %v4172_v2  ;;  %v1030_v26 = vpop.f32.mrf.mxu1  ;;  %4071 = vmatmul.mubr.msk.bf16.vlgmr.msra.gmra.mxu1 %vm337_vm2, %v3213_v15 }
 0x105   : > { %826 = vst [vmem:[%s4727_s25] sm:$0xff] %v824_v21  ;;  %v817_v28 = vmul.f32 %v4715_v22, %v809_v23  ;;  %v951_v38 = vadd.f32 %v944_v1, %v904_v32 }
 0x106   : > { %v906_v25 = vpop.f32.mrf.mxu0  ;;  %v3784_v29 = vpop.f32.mrf.mxu1 }
 0x107   : > { %v825_v30 = vadd.f32 %v4720_v12, %v817_v28  ;;  %v907_v39 = vadd.f32 %v906_v25, %v4690_v55 }
 0x108   : > { %v3767_v31 = vpop.f32.mrf.mxu0  ;;  %v1033_v33 = vpop.f32.mrf.mxu1 }
 0x109   : > { %827 = vst [vmem:[%s4727_s25 + $0x8] sm:$0x3f] %v825_v30  ;;  %v952_v45 = vadd.f32 %v947_v27, %v907_v39 }
 0x10a   : > { %v987_v34 = vpop.f32.mrf.mxu0  ;;  %4065 = vmatmul.mubr.msk.bf16.vlgmr.msra.gmra.mxu0 %vm337_vm2, %v4681_v50  ;;  %v3785_v4 = vpop.f32.mrf.mxu1 }
 0x10b   : > { %4075 = vmatpush3.bf16.msra.mxu0 %v4356_v35  ;;  %4076 = vmatprep.mubr.msk.bf16.mxu0 %vm4173_vm1, %v4172_v2  ;;  %v994_v42 = vadd.f32 %v987_v34, %v951_v38 }
 0x10c   : > { %v3778_v36 = vpop.f32.mrf.mxu0  ;;  %v1124_v37 = vpop.f32.mrf.mxu1 }
 0x10d   : > { %v1037_v46 = vadd.f32 %v1030_v26, %v994_v42 }
 0x10e   : > { %v990_v40 = vpop.f32.mrf.mxu0  ;;  %v3796_v41 = vpop.f32.mrf.mxu1 }
 0x10f   : > { %v995_v47 = vadd.f32 %v990_v40, %v952_v45 }
 0x110   : > { %v3779_v43 = vpop.f32.mrf.mxu0  ;;  %v1127_v44 = vpop.f32.mrf.mxu1 }
 0x111   : > { %v1038_v52 = vadd.f32 %v1033_v33, %v995_v47 }
 0x112   : > { %v1073_v7 = vpop.f32.mrf.mxu0  ;;  %4077 = vmatmul.mubr.msk.bf16.vlgmr.msra.gmra.mxu0 %vm337_vm2, %v3260_v3  ;;  %v3797_v35 = vpop.f32.mrf.mxu1 }
 0x113   : > { %v1080_v49 = vadd.f32 %v1073_v7, %v1037_v46 }
 0x114   : > { %v3790_v2 = vpop.f32.mrf.mxu0  ;;  %v1223_v48 = vpop.f32.mrf.mxu1 }
 0x115   : > { %v1131_v50 = vadd.f32 %v1124_v37, %v1080_v49 }
 0x116   : > { %v1076_v51 = vpop.f32.mrf.mxu0  ;;  %v3808_v14 = vpop.f32.mrf.mxu1 }
 0x117   : > { %v1081_v55 = vadd.f32 %v1076_v51, %v1038_v52 }
 0x118   : > { %v3791_v53 = vpop.f32.mrf.mxu0  ;;  %v1226_v54 = vpop.f32.mrf.mxu1 }
 0x119   : > { %v1132_v62 = vadd.f32 %v1127_v44, %v1081_v55 }
 0x11a   : > { %v1176_v56 = vpop.f32.mrf.mxu0  ;;  %v3809_v57 = vpop.f32.mrf.mxu1 }
 0x11b   : > { %v1183_v58 = vadd.f32 %v1176_v56, %v1131_v50 }
 0x11c   : > { %v3802_v59 = vpop.f32.mrf.mxu0  ;;  %v1318_v61 = vpop.f32.mrf.mxu1 }
 0x11d   : > { %v1230_v63 = vadd.f32 %v1223_v48, %v1183_v58 }
 0x11e   : > { %v1179_v1 = vpop.f32.mrf.mxu0  ;;  %v3820_v5 = vpop.f32.mrf.mxu1 }
 0x11f   : > { %v1232_v6 = vadd.f32 %v4696_v16, %v1230_v63  ;;  %v1184_v60 = vadd.f32 %v1179_v1, %v1132_v62 }
 0x120   : > { %v3803_v8 = vpop.f32.mrf.mxu0  ;;  %v1321_v9 = vpop.f32.mrf.mxu1 }
 0x121   : > { %v1234_v0 = vmax.f32 %v1232_v6, 0.0  ;;  %v1231_v10 = vadd.f32 %v1226_v54, %v1184_v60 }
 0x122   : > { %v1277_v11 = vpop.f32.mrf.mxu0  ;;  %v3821_v13 = vpop.f32.mrf.mxu1 }
 0x123   : > { %v1236_v27 = vmul.f32 %v4715_v22, %v1234_v0  ;;  %v1233_v15 = vadd.f32 %v4696_v16, %v1231_v10  ;;  %v1319_v4 = vadd.f32 %v1318_v61, %v1277_v11 }
 0x124   : > { %v3814_v17 = vpop.f32.mrf.mxu0  ;;  %v1402_v18 = vpop.f32.mrf.mxu1 }
 0x125   : > { %v1238_v19 = vadd.f32 %v4720_v12, %v1236_v27  ;;  %v1235_v20 = vmax.f32 %v1233_v15, 0.0 }
 0x126   : > { %v1280_v21 = vpop.f32.mrf.mxu0  ;;  %v3832_v23 = vpop.f32.mrf.mxu1 }
 0x127   : > { %3510 = vst [vmem:[%s4727_s25 + $0x10] sm:$0xff] %v1238_v19  ;;  %v1237_v24 = vmul.f32 %v4715_v22, %v1235_v20  ;;  %v1322_v3 = vadd.f32 %v1321_v9, %v1280_v21 }
 0x128   : > { %v3815_v26 = vpop.f32.mrf.mxu0  ;;  %v1405_v28 = vpop.f32.mrf.mxu1 }
 0x129   : > { %v1239_v25 = vadd.f32 %v4720_v12, %v1237_v24 }
 0x12a   : > { %v1359_v29 = vpop.f32.mrf.mxu0  ;;  %v3833_v30 = vpop.f32.mrf.mxu1 }
 0x12b   : > { %3511 = vst [vmem:[%s4727_s25 + $0x18] sm:$0x3f] %v1239_v25  ;;  %v1366_v38 = vadd.f32 %v1359_v29, %v1319_v4 }
 0x12c   : > { %v3826_v31 = vpop.f32.mrf.mxu0  ;;  %v1488_v33 = vpop.f32.mrf.mxu1 }
 0x12d   : > { %v1409_v43 = vadd.f32 %v1402_v18, %v1366_v38 }
 0x12e   : > { %v1362_v32 = vpop.f32.mrf.mxu0  ;;  %v3844_v34 = vpop.f32.mrf.mxu1 }
 0x12f   : > { %v1367_v44 = vadd.f32 %v1362_v32, %v1322_v3 }
 0x130   : > { %v3827_v36 = vpop.f32.mrf.mxu0  ;;  %v1491_v37 = vpop.f32.mrf.mxu1 }
 0x131   : > { %v1410_v2 = vadd.f32 %v1405_v28, %v1367_v44 }
 0x132   : > { %v1445_v39 = vpop.f32.mrf.mxu0  ;;  %v3845_v40 = vpop.f32.mrf.mxu1 }
 0x133   : > { %v1452_v35 = vadd.f32 %v1445_v39, %v1409_v43 }
 0x134   : > { %v3838_v41 = vpop.f32.mrf.mxu0  ;;  %v1591_v42 = vpop.f32.mrf.mxu1 }
 0x135   : > { %v1495_v51 = vadd.f32 %v1488_v33, %v1452_v35 }
 0x136   : > { %v1448_v45 = vpop.f32.mrf.mxu0  ;;  %v3856_v7 = vpop.f32.mrf.mxu1 }
 0x137   : > { %v1453_v14 = vadd.f32 %v1448_v45, %v1410_v2 }
 0x138   : > { %v3839_v46 = vpop.f32.mrf.mxu0  ;;  %v1594_v47 = vpop.f32.mrf.mxu1 }
 0x139   : > { %v1496_v56 = vadd.f32 %v1491_v37, %v1453_v14 }
 0x13a   : > { %v1539_v48 = vpop.f32.mrf.mxu0  ;;  %v3857_v49 = vpop.f32.mrf.mxu1 }
 0x13b   : > { %v1546_v54 = vadd.f32 %v1539_v48, %v1495_v51 }
 0x13c   : > { %v3850_v52 = vpop.f32.mrf.mxu0  ;;  %v1692_v53 = vpop.f32.mrf.mxu1 }
 0x13d   : > { %v1598_v59 = vadd.f32 %v1591_v42, %v1546_v54 }
 0x13e   : > { %v1542_v50 = vpop.f32.mrf.mxu0  ;;  %v3868_v55 = vpop.f32.mrf.mxu1 }
 0x13f   : > { %v1547_v61 = vadd.f32 %v1542_v50, %v1496_v56 }
 0x140   : > { %v3851_v57 = vpop.f32.mrf.mxu0  ;;  %v1695_v58 = vpop.f32.mrf.mxu1 }
 0x141   : > { %v1599_v60 = vadd.f32 %v1594_v47, %v1547_v61 }
 0x142   : > { %v1638_v62 = vpop.f32.mrf.mxu0  ;;  %v3869_v63 = vpop.f32.mrf.mxu1 }
 0x143   : > { %v1645_v1 = vadd.f32 %v1638_v62, %v1598_v59 }
 0x144   : > { %v3862_v5 = vpop.f32.mrf.mxu0  ;;  %v1774_v6 = vpop.f32.mrf.mxu1 }
 0x145   : > { %v1647_v8 = vadd.f32 %v4696_v16, %v1645_v1 }
 0x146   : > { %v1641_v9 = vpop.f32.mrf.mxu0  ;;  %v3880_v0 = vpop.f32.mrf.mxu1 }
 0x147   : > { %v1649_v10 = vmax.f32 %v1647_v8, 0.0  ;;  %v1646_v11 = vadd.f32 %v1641_v9, %v1599_v60 }
 0x148   : > { %v3863_v13 = vpop.f32.mrf.mxu0  ;;  %v1777_v27 = vpop.f32.mrf.mxu1 }
 0x149   : > { %v1651_v15 = vmul.f32 %v4715_v22, %v1649_v10  ;;  %v1648_v17 = vadd.f32 %v4696_v16, %v1646_v11 }
 0x14a   : > { %v1733_v18 = vpop.f32.mrf.mxu0  ;;  %v3881_v19 = vpop.f32.mrf.mxu1 }
 0x14b   : > { %v1653_v20 = vadd.f32 %v4720_v12, %v1651_v15  ;;  %v1650_v21 = vmax.f32 %v1648_v17, 0.0  ;;  %v1734_v33 = vadd.f32 %v1733_v18, %v1692_v53 }
 0x14c   : > { %v3874_v23 = vpop.f32.mrf.mxu0  ;;  %v1860_v24 = vpop.f32.mrf.mxu1 }
 0x14d   : > { %3522 = vst [vmem:[%s4727_s25 + $0x20] sm:$0xff] %v1653_v20  ;;  %v1652_v26 = vmul.f32 %v4715_v22, %v1650_v21  ;;  %v1781_v37 = vadd.f32 %v1774_v6, %v1734_v33 }
 0x14e   : > { %v1736_v28 = vpop.f32.mrf.mxu0  ;;  %v3892_v25 = vpop.f32.mrf.mxu1 }
 0x14f   : > { %v1654_v29 = vadd.f32 %v4720_v12, %v1652_v26  ;;  %v1737_v38 = vadd.f32 %v1736_v28, %v1695_v58 }
 0x150   : > { %v3875_v30 = vpop.f32.mrf.mxu0  ;;  %v1863_v31 = vpop.f32.mrf.mxu1 }
 0x151   : > { %3523 = vst [vmem:[%s4727_s25 + $0x28] sm:$0x3f] %v1654_v29  ;;  %v1782_v43 = vadd.f32 %v1777_v27, %v1737_v38 }
 0x152   : > { %v1817_v32 = vpop.f32.mrf.mxu0  ;;  %v3893_v34 = vpop.f32.mrf.mxu1 }
 0x153   : > { %v1824_v3 = vadd.f32 %v1817_v32, %v1781_v37 }
 0x154   : > { %v3886_v4 = vpop.f32.mrf.mxu0  ;;  %v1954_v36 = vpop.f32.mrf.mxu1 }
 0x155   : > { %v1867_v7 = vadd.f32 %v1860_v24, %v1824_v3 }
 0x156   : > { %v1820_v39 = vpop.f32.mrf.mxu0  ;;  %v3904_v40 = vpop.f32.mrf.mxu1 }
 0x157   : > { %v1825_v35 = vadd.f32 %v1820_v39, %v1782_v43 }
 0x158   : > { %v3887_v41 = vpop.f32.mrf.mxu0  ;;  %v1957_v42 = vpop.f32.mrf.mxu1 }
 0x159   : > { %v1868_v51 = vadd.f32 %v1863_v31, %v1825_v35 }
 0x15a   : > { %v1903_v44 = vpop.f32.mrf.mxu0  ;;  %v3905_v45 = vpop.f32.mrf.mxu1 }
 0x15b   : > { %v1910_v2 = vadd.f32 %v1903_v44, %v1867_v7 }
 0x15c   : > { %v3898_v46 = vpop.f32.mrf.mxu0  ;;  %v2053_v47 = vpop.f32.mrf.mxu1 }
 0x15d   : > { %v1961_v53 = vadd.f32 %v1954_v36, %v1910_v2 }
 0x15e   : > { %v1906_v48 = vpop.f32.mrf.mxu0  ;;  %v3916_v49 = vpop.f32.mrf.mxu1 }
 0x15f   : > { %v1911_v54 = vadd.f32 %v1906_v48, %v1868_v51 }
 0x160   : > { %v3899_v14 = vpop.f32.mrf.mxu0  ;;  %v2056_v52 = vpop.f32.mrf.mxu1 }
 0x161   : > { %v1962_v59 = vadd.f32 %v1957_v42, %v1911_v54 }
 0x162   : > { %v2006_v50 = vpop.f32.mrf.mxu0  ;;  %v3917_v55 = vpop.f32.mrf.mxu1 }
 0x163   : > { %v2013_v56 = vadd.f32 %v2006_v50, %v1961_v53 }
 0x164   : > { %v3910_v57 = vpop.f32.mrf.mxu0  ;;  %v2148_v58 = vpop.f32.mrf.mxu1 }
 0x165   : > { %v2060_v61 = vadd.f32 %v2053_v47, %v2013_v56 }
 0x166   : > { %v2009_v62 = vpop.f32.mrf.mxu0  ;;  %v3928_v63 = vpop.f32.mrf.mxu1 }
 0x167   : > { %v2062_v1 = vadd.f32 %v4696_v16, %v2060_v61  ;;  %v2014_v5 = vadd.f32 %v2009_v62, %v1962_v59 }
 0x168   : > { %v3911_v6 = vpop.f32.mrf.mxu0  ;;  %v2151_v60 = vpop.f32.mrf.mxu1 }
 0x169   : > { %v2064_v8 = vmax.f32 %v2062_v1, 0.0  ;;  %v2061_v9 = vadd.f32 %v2056_v52, %v2014_v5 }
 0x16a   : > { %v2107_v0 = vpop.f32.mrf.mxu0  ;;  %v3929_v10 = vpop.f32.mrf.mxu1 }
 0x16b   : > { %v2066_v11 = vmul.f32 %v4715_v22, %v2064_v8  ;;  %v2063_v13 = vadd.f32 %v4696_v16, %v2061_v9  ;;  %v2149_v32 = vadd.f32 %v2148_v58, %v2107_v0 }
 0x16c   : > { %v3922_v27 = vpop.f32.mrf.mxu0  ;;  %v2232_v15 = vpop.f32.mrf.mxu1 }
 0x16d   : > { %v2068_v17 = vadd.f32 %v4720_v12, %v2066_v11  ;;  %v2065_v18 = vmax.f32 %v2063_v13, 0.0 }
 0x16e   : > { %v2110_v19 = vpop.f32.mrf.mxu0  ;;  %v3940_v20 = vpop.f32.mrf.mxu1 }
 0x16f   : > { %3534 = vst [vmem:[%s4727_s25 + $0x30] sm:$0xff] %v2068_v17  ;;  %v2067_v21 = vmul.f32 %v4715_v22, %v2065_v18  ;;  %v2152_v39 = vadd.f32 %v2151_v60, %v2110_v19 }
 0x170   : > { %v3923_v23 = vpop.f32.mrf.mxu0  ;;  %v2235_v24 = vpop.f32.mrf.mxu1 }
 0x171   : > { %v2069_v26 = vadd.f32 %v4720_v12, %v2067_v21 }
 0x172   : > { %v2189_v28 = vpop.f32.mrf.mxu0  ;;  %v3941_v25 = vpop.f32.mrf.mxu1 }
 0x173   : > { %3535 = vst [vmem:[%s4727_s25 + $0x38] sm:$0x3f] %v2069_v26  ;;  %v2196_v36 = vadd.f32 %v2189_v28, %v2149_v32 }
 0x174   : > { %v3934_v29 = vpop.f32.mrf.mxu0  ;;  %v2318_v30 = vpop.f32.mrf.mxu1 }
 0x175   : > { %v2239_v41 = vadd.f32 %v2232_v15, %v2196_v36 }
 0x176   : > { %v2192_v31 = vpop.f32.mrf.mxu0  ;;  %v3952_v33 = vpop.f32.mrf.mxu1 }
 0x177   : > { %v2197_v42 = vadd.f32 %v2192_v31, %v2152_v39 }
 0x178   : > { %v3935_v34 = vpop.f32.mrf.mxu0  ;;  %v2321_v4 = vpop.f32.mrf.mxu1 }
 0x179   : > { %v2240_v46 = vadd.f32 %v2235_v24, %v2197_v42 }
 0x17a   : > { %v2275_v37 = vpop.f32.mrf.mxu0  ;;  %v3953_v38 = vpop.f32.mrf.mxu1 }
 0x17b   : > { %v2282_v45 = vadd.f32 %v2275_v37, %v2239_v41 }
 0x17c   : > { %v3946_v40 = vpop.f32.mrf.mxu0  ;;  %v2421_v3 = vpop.f32.mrf.mxu1 }
 0x17d   : > { %v2325_v48 = vadd.f32 %v2318_v30, %v2282_v45 }
 0x17e   : > { %v2278_v43 = vpop.f32.mrf.mxu0  ;;  %v3964_v44 = vpop.f32.mrf.mxu1 }
 0x17f   : > { %v2283_v49 = vadd.f32 %v2278_v43, %v2240_v46 }
 0x180   : > { %v3947_v7 = vpop.f32.mrf.mxu0  ;;  %v2424_v35 = vpop.f32.mrf.mxu1 }
 0x181   : > { %v2326_v50 = vadd.f32 %v2321_v4, %v2283_v49 }
 0x182   : > { %v2369_v47 = vpop.f32.mrf.mxu0  ;;  %v3965_v2 = vpop.f32.mrf.mxu1 }
 0x183   : > { %v2376_v52 = vadd.f32 %v2369_v47, %v2325_v48 }
 0x184   : > { %v3958_v51 = vpop.f32.mrf.mxu0  ;;  %v2522_v14 = vpop.f32.mrf.mxu1 }
 0x185   : > { %v2428_v57 = vadd.f32 %v2421_v3, %v2376_v52 }
 0x186   : > { %v2372_v53 = vpop.f32.mrf.mxu0  ;;  %v3976_v54 = vpop.f32.mrf.mxu1 }
 0x187   : > { %v2377_v58 = vadd.f32 %v2372_v53, %v2326_v50 }
 0x188   : > { %v3959_v55 = vpop.f32.mrf.mxu0  ;;  %v2525_v56 = vpop.f32.mrf.mxu1 }
 0x189   : > { %v2429_v5 = vadd.f32 %v2424_v35, %v2377_v58 }
 0x18a   : > { %v2468_v59 = vpop.f32.mrf.mxu0  ;;  %v3977_v61 = vpop.f32.mrf.mxu1 }
 0x18b   : > { %v2475_v62 = vadd.f32 %v2468_v59, %v2428_v57 }
 0x18c   : > { %v3970_v63 = vpop.f32.mrf.mxu0  ;;  %v2604_v1 = vpop.f32.mrf.mxu1 }
 0x18d   : > { %v2477_v6 = vadd.f32 %v4696_v16, %v2475_v62 }
 0x18e   : > { %v2471_v60 = vpop.f32.mrf.mxu0  ;;  %v3988_v8 = vpop.f32.mrf.mxu1 }
 0x18f   : > { %v2479_v9 = vmax.f32 %v2477_v6, 0.0  ;;  %v2476_v0 = vadd.f32 %v2471_v60, %v2429_v5 }
 0x190   : > { %v3971_v10 = vpop.f32.mrf.mxu0  ;;  %v2607_v11 = vpop.f32.mrf.mxu1 }
 0x191   : > { %v2481_v13 = vmul.f32 %v4715_v22, %v2479_v9  ;;  %v2478_v27 = vadd.f32 %v4696_v16, %v2476_v0 }
 0x192   : > { %v2563_v15 = vpop.f32.mrf.mxu0  ;;  %v3989_v17 = vpop.f32.mrf.mxu1 }
 0x193   : > { %v2483_v18 = vadd.f32 %v4720_v12, %v2481_v13  ;;  %v2480_v19 = vmax.f32 %v2478_v27, 0.0  ;;  %v2564_v30 = vadd.f32 %v2563_v15, %v2522_v14 }
 0x194   : > { %v3982_v20 = vpop.f32.mrf.mxu0  ;;  %v2690_v21 = vpop.f32.mrf.mxu1 }
 0x195   : > { %3546 = vst [vmem:[%s4727_s25 + $0x40] sm:$0xff] %v2483_v18  ;;  %v2482_v23 = vmul.f32 %v4715_v22, %v2480_v19  ;;  %v2611_v4 = vadd.f32 %v2604_v1, %v2564_v30 }
 0x196   : > { %v2566_v24 = vpop.f32.mrf.mxu0  ;;  %v4000_v26 = vpop.f32.mrf.mxu1 }
 0x197   : > { %v2484_v28 = vadd.f32 %v4720_v12, %v2482_v23  ;;  %v2567_v36 = vadd.f32 %v2566_v24, %v2525_v56 }
 0x198   : > { %v3983_v25 = vpop.f32.mrf.mxu0  ;;  %v2693_v29 = vpop.f32.mrf.mxu1 }
 0x199   : > { %3547 = vst [vmem:[%s4727_s25 + $0x48] sm:$0x3f] %v2484_v28  ;;  %v2612_v41 = vadd.f32 %v2607_v11, %v2567_v36 }
 0x19a   : > { %v2647_v31 = vpop.f32.mrf.mxu0  ;;  %v4001_v33 = vpop.f32.mrf.mxu1 }
 0x19b   : > { %v2654_v39 = vadd.f32 %v2647_v31, %v2611_v4 }
 0x19c   : > { %v3994_v32 = vpop.f32.mrf.mxu0  ;;  %v2784_v34 = vpop.f32.mrf.mxu1 }
 0x19d   : > { %v2697_v44 = vadd.f32 %v2690_v21, %v2654_v39 }
 0x19e   : > { %v2650_v37 = vpop.f32.mrf.mxu0  ;;  %v4012_v38 = vpop.f32.mrf.mxu1 }
 0x19f   : > { %v2655_v45 = vadd.f32 %v2650_v37, %v2612_v41 }
 0x1a0   : > { %v3995_v40 = vpop.f32.mrf.mxu0  ;;  %v2787_v3 = vpop.f32.mrf.mxu1 }
 0x1a1   : > { %v2698_v48 = vadd.f32 %v2693_v29, %v2655_v45 }
 0x1a2   : > { %v2733_v42 = vpop.f32.mrf.mxu0  ;;  %v4013_v43 = vpop.f32.mrf.mxu1 }
 0x1a3   : > { %v2740_v46 = vadd.f32 %v2733_v42, %v2697_v44 }
 0x1a4   : > { %v4006_v7 = vpop.f32.mrf.mxu0  ;;  %v2883_v35 = vpop.f32.mrf.mxu1 }
 0x1a5   : > { %v2791_v14 = vadd.f32 %v2784_v34, %v2740_v46 }
 0x1a6   : > { %v2736_v47 = vpop.f32.mrf.mxu0  ;;  %v4024_v2 = vpop.f32.mrf.mxu1 }
 0x1a7   : > { %v2741_v52 = vadd.f32 %v2736_v47, %v2698_v48 }
 0x1a8   : > { %v4007_v49 = vpop.f32.mrf.mxu0  ;;  %v2886_v51 = vpop.f32.mrf.mxu1 }
 0x1a9   : > { %v2792_v57 = vadd.f32 %v2787_v3, %v2741_v52 }
 0x1aa   : > { %v2836_v53 = vpop.f32.mrf.mxu0  ;;  %v4025_v54 = vpop.f32.mrf.mxu1 }
 0x1ab   : > { %v2843_v50 = vadd.f32 %v2836_v53, %v2791_v14 }
 0x1ac   : > { %v4018_v55 = vpop.f32.mrf.mxu0  ;;  %v2978_v56 = vpop.f32.mrf.mxu1 }
 0x1ad   : > { %v2890_v58 = vadd.f32 %v2883_v35, %v2843_v50 }
 0x1ae   : > { %v2839_v59 = vpop.f32.mrf.mxu0  ;;  %v4036_v61 = vpop.f32.mrf.mxu1 }
 0x1af   : > { %v2892_v62 = vadd.f32 %v4696_v16, %v2890_v58  ;;  %v2844_v63 = vadd.f32 %v2839_v59, %v2792_v57 }
 0x1b0   : > { %v4019_v1 = vpop.f32.mrf.mxu0  ;;  %v2981_v5 = vpop.f32.mrf.mxu1 }
 0x1b1   : > { %v2894_v6 = vmax.f32 %v2892_v62, 0.0  ;;  %v2891_v60 = vadd.f32 %v2886_v51, %v2844_v63 }
 0x1b2   : > { %v2937_v8 = vpop.f32.mrf.mxu0  ;;  %v4037_v9 = vpop.f32.mrf.mxu1 }
 0x1b3   : > { %v2896_v0 = vmul.f32 %v4715_v22, %v2894_v6  ;;  %v2893_v10 = vadd.f32 %v4696_v16, %v2891_v60  ;;  %v2979_v31 = vadd.f32 %v2978_v56, %v2937_v8 }
 0x1b4   : > { %v4030_v11 = vpop.f32.mrf.mxu0  ;;  %v3062_v13 = vpop.f32.mrf.mxu1 }
 0x1b5   : > { %v2898_v27 = vadd.f32 %v4720_v12, %v2896_v0  ;;  %v2895_v15 = vmax.f32 %v2893_v10, 0.0 }
 0x1b6   : > { %v2940_v17 = vpop.f32.mrf.mxu0  ;;  %v4048_v18 = vpop.f32.mrf.mxu1 }
 0x1b7   : > { %3558 = vst [vmem:[%s4727_s25 + $0x50] sm:$0xff] %v2898_v27  ;;  %v2897_v19 = vmul.f32 %v4715_v22, %v2895_v15  ;;  %v2982_v37 = vadd.f32 %v2981_v5, %v2940_v17 }
 0x1b8   : > { %v4031_v20 = vpop.f32.mrf.mxu0  ;;  %v3065_v21 = vpop.f32.mrf.mxu1 }
 0x1b9   : > { %v2899_v23 = vadd.f32 %v4720_v12, %v2897_v19 }
 0x1ba   : > { %v3019_v24 = vpop.f32.mrf.mxu0  ;;  %v4049_v26 = vpop.f32.mrf.mxu1 }
 0x1bb   : > { %3559 = vst [vmem:[%s4727_s25 + $0x58] sm:$0x3f] %v2899_v23  ;;  %v3026_v34 = vadd.f32 %v3019_v24, %v2979_v31 }
 0x1bc   : > { %v4042_v28 = vpop.f32.mrf.mxu0  ;;  %v3148_v25 = vpop.f32.mrf.mxu1 }
 0x1bd   : > { %v3069_v40 = vadd.f32 %v3062_v13, %v3026_v34 }
 0x1be   : > { %v3022_v29 = vpop.f32.mrf.mxu0  ;;  %v4060_v30 = vpop.f32.mrf.mxu1 }
 0x1bf   : > { %v3027_v3 = vadd.f32 %v3022_v29, %v2982_v37 }
 0x1c0   : > { %v4043_v33 = vpop.f32.mrf.mxu0  ;;  %v3151_v32 = vpop.f32.mrf.mxu1 }
 0x1c1   : > { %v3070_v7 = vadd.f32 %v3065_v21, %v3027_v3 }
 0x1c2   : > { %v3105_v4 = vpop.f32.mrf.mxu0  ;;  %v4061_v36 = vpop.f32.mrf.mxu1 }
 0x1c3   : > { %v3112_v43 = vadd.f32 %v3105_v4, %v3069_v40 }
 0x1c4   : > { %v4054_v38 = vpop.f32.mrf.mxu0  ;;  %v3251_v39 = vpop.f32.mrf.mxu1 }
 0x1c5   : > { %v3155_v47 = vadd.f32 %v3148_v25, %v3112_v43 }
 0x1c6   : > { %v3108_v41 = vpop.f32.mrf.mxu0  ;;  %v4072_v42 = vpop.f32.mrf.mxu1 }
 0x1c7   : > { %v3113_v2 = vadd.f32 %v3108_v41, %v3070_v7 }
 0x1c8   : > { %v4055_v44 = vpop.f32.mrf.mxu0  ;;  %v3254_v45 = vpop.f32.mrf.mxu1 }
 0x1c9   : > { %v3156_v14 = vadd.f32 %v3151_v32, %v3113_v2 }
 0x1ca   : > { %v3199_v35 = vpop.f32.mrf.mxu0  ;;  %v4073_v46 = vpop.f32.mrf.mxu1 }
 0x1cb   : > { %v3206_v49 = vadd.f32 %v3199_v35, %v3155_v47 }
 0x1cc   : > { %v4066_v48 = vpop.f32.mrf.mxu0 }
 0x1cd   : > { %v3258_v53 = vadd.f32 %v3251_v39, %v3206_v49 }
 0x1ce   : > { %v3202_v51 = vpop.f32.mrf.mxu0 }
 0x1cf   : > { %v3207_v54 = vadd.f32 %v3202_v51, %v3156_v14 }
 0x1d0   : > { %v4067_v52 = vpop.f32.mrf.mxu0 }
 0x1d1   : > { %v3259_v57 = vadd.f32 %v3254_v45, %v3207_v54 }
 0x1d2   : > { %v3298_v50 = vpop.f32.mrf.mxu0 }
 0x1d3   : > { %v3305_v55 = vadd.f32 %v3298_v50, %v3258_v53 }
 0x1d4   : > { %v4078_v56 = vpop.f32.mrf.mxu0 }
 0x1d5   : > { %v3307_v58 = vadd.f32 %v4696_v16, %v3305_v55 }
 0x1d6   : > { %v3301_v59 = vpop.f32.mrf.mxu0 }
 0x1d7   : > { %v3309_v61 = vmax.f32 %v3307_v58, 0.0  ;;  %v3306_v62 = vadd.f32 %v3301_v59, %v3259_v57 }
 0x1d8   : > { %v4079_v63 = vpop.f32.mrf.mxu0 }
 0x1d9   : > { %v3311_v1 = vmul.f32 %v4715_v22, %v3309_v61  ;;  %v3308_v5 = vadd.f32 %v4696_v16, %v3306_v62 }
 0x1db   : > { %v3313_v6 = vadd.f32 %v4720_v12, %v3311_v1  ;;  %v3310_v60 = vmax.f32 %v3308_v5, 0.0 }
 0x1dd   : > { %3570 = vst [vmem:[%s4727_s25 + $0x60] sm:$0xff] %v3313_v6  ;;  %v3312_v8 = vmul.f32 %v4715_v22, %v3310_v60 }
 0x1df   : > { %v3314_v9 = vadd.f32 %v4720_v12, %v3312_v8 }
 0x1e1   : > { %3571 = vst [vmem:[%s4727_s25 + $0x68] sm:$0x3f] %v3314_v9 }
 0x1e2 PF: > { %s15_s22 = sadd.s32 1, %s4170_s22   ;;  %s4820_s18 = smov %s4162_s20 }
 0x1e3   : > { %p12_p7 = scmp.ge.s32.totalorder %s15_s22, 6   ;;  %s4821_s19 = smov %s4166_s21 }
 0x1e4   : > { %s4822_s20 = smov %s4825_s23  ;;  %s4823_s21 = smov %s4829_s24 }
 0x1e5   :  { %14 = sbr.rel (!%p12_p7) target bundleno = 3 (0x3), region = 93 }

</bundles_post_ra>
